<compile_context>
chip_gen: v7x
topology: tpu7x:2x2x1
jax: 0.10.0
libtpu: 0.0.40
codegen_flags: <defaults>
</compile_context>

<pallas_src>
import functools

import jax
import jax.numpy as jnp
from jax.experimental import pallas as pl
from jax.experimental.pallas import tpu as pltpu


# ------------------------------ helpers ------------------------------------ #

def _round_up(x, m):
    return (x + m - 1) // m * m


def _pad_last(x, target):
    pad = target - x.shape[-1]
    if pad == 0:
        return x
    return jnp.pad(x, [(0, 0)] * (x.ndim - 1) + [(0, pad)])


def _pad2(a, rows, cols):
    return jnp.pad(a, ((0, rows - a.shape[0]), (0, cols - a.shape[1])))


def _choose_tm(m):
    # Fixed MXU-friendly tile; shrink (multiple of 8) only for tiny problems.
    return min(256, _round_up(m, 8))


def _choose_tk(k):
    # k is always a multiple of 128 after channel padding.
    for t in (1024, 512, 256, 128):
        if k % t == 0:
            return min(t, k)
    return k


def fold_bn(gamma, beta, mean, var, eps=1e-5):
    scale = gamma / jnp.sqrt(var + eps)
    bias = beta - mean * scale
    return scale, bias


# ----------------------------- Pallas kernels ------------------------------- #

def _matmul_bn_kernel(apply_relu, has_add, x_ref, w_ref, s_ref, b_ref, *rest):
    """acc += x @ w over the K grid axis; epilogue: *scale + bias [+ add] [relu]."""
    if has_add:
        a_ref, o_ref, acc_ref = rest
    else:
        o_ref, acc_ref = rest
    k = pl.program_id(1)

    @pl.when(k == 0)
    def _():
        acc_ref[...] = jnp.zeros_like(acc_ref)

    acc_ref[...] += jnp.dot(x_ref[...], w_ref[...],
                            preferred_element_type=jnp.float32)

    @pl.when(k == pl.num_programs(1) - 1)
    def _():
        y = acc_ref[...] * s_ref[...] + b_ref[...]
        if has_add:
            y = y + a_ref[...].astype(jnp.float32)
        if apply_relu:
            y = jnp.maximum(y, 0.0)
        o_ref[...] = y.astype(o_ref.dtype)


def _dual_matmul_bn_relu_kernel(x1_ref, x2_ref, w1_ref, w2_ref, s_ref, b_ref, o_ref):
    """Concat-free 1x1 conv: relu((x1 @ w1 + x2 @ w2) * scale + bias)."""
    y = jnp.dot(x1_ref[...], w1_ref[...], preferred_element_type=jnp.float32)
    y = y + jnp.dot(x2_ref[...], w2_ref[...], preferred_element_type=jnp.float32)
    y = y * s_ref[...] + b_ref[...]
    y = jnp.maximum(y, 0.0)
    o_ref[...] = y.astype(o_ref.dtype)


_VMEM_LIMIT = 48 * 1024 * 1024  # explicit scoped-VMEM budget (fits v7x's 64 MiB)


def matmul_bn_act(x2d, w, scale, bias, add=None, relu=False, out_dtype=jnp.bfloat16):
    """Fused (conv-as-matmul, K-tiled) + folded-BN + optional skip-add + optional ReLU."""
    m, k = x2d.shape
    cout = w.shape[1]
    assert k % 128 == 0 and cout % 128 == 0, (k, cout)
    tm = _choose_tm(m)
    tk = _choose_tk(k)
    grid = (pl.cdiv(m, tm), k // tk)

    in_specs = [
        pl.BlockSpec((tm, tk), lambda i, kk: (i, kk)),     # activations (bf16)
        pl.BlockSpec((tk, cout), lambda i, kk: (kk, 0)),   # weight tile (bf16)
        pl.BlockSpec((1, cout), lambda i, kk: (0, 0)),     # bn scale (f32)
        pl.BlockSpec((1, cout), lambda i, kk: (0, 0)),     # bn bias  (f32)
    ]
    args = [x2d, w, scale, bias]
    if add is not None:
        in_specs.append(pl.BlockSpec((tm, cout), lambda i, kk: (i, 0)))
        args.append(add)

    kernel = functools.partial(_matmul_bn_kernel, relu, add is not None)
    return pl.pallas_call(
        kernel,
        out_shape=jax.ShapeDtypeStruct((m, cout), out_dtype),
        grid=grid,
        in_specs=in_specs,
        out_specs=pl.BlockSpec((tm, cout), lambda i, kk: (i, 0)),
        scratch_shapes=[pltpu.VMEM((tm, cout), jnp.float32)],
        compiler_params=pltpu.CompilerParams(
            dimension_semantics=("parallel", "arbitrary"),
            vmem_limit_bytes=_VMEM_LIMIT),
    )(*args)


def dual_matmul_bn_relu(x1, x2, w1, w2, scale, bias, out_dtype=jnp.bfloat16):
    """First 1x1 conv of the residual branch without materializing the channel concat."""
    m, k1 = x1.shape
    _, k2 = x2.shape
    cout = w1.shape[1]
    assert k1 % 128 == 0 and k2 % 128 == 0 and cout % 128 == 0
    tm = _choose_tm(m)
    grid = (pl.cdiv(m, tm),)
    return pl.pallas_call(
        _dual_matmul_bn_relu_kernel,
        out_shape=jax.ShapeDtypeStruct((m, cout), out_dtype),
        grid=grid,
        in_specs=[
            pl.BlockSpec((tm, k1), lambda i: (i, 0)),
            pl.BlockSpec((tm, k2), lambda i: (i, 0)),
            pl.BlockSpec((k1, cout), lambda i: (0, 0)),
            pl.BlockSpec((k2, cout), lambda i: (0, 0)),
            pl.BlockSpec((1, cout), lambda i: (0, 0)),
            pl.BlockSpec((1, cout), lambda i: (0, 0)),
        ],
        out_specs=pl.BlockSpec((tm, cout), lambda i: (i, 0)),
        compiler_params=pltpu.CompilerParams(
            dimension_semantics=("parallel",),
            vmem_limit_bytes=_VMEM_LIMIT),
    )(x1, x2, w1, w2, scale, bias)


# ------------------------- one-time weight preparation ----------------------- #

def prepare_params(p, stride=1):
    """Fold BN, transpose weights to matmul layout, pad channels to 128, cast to bf16."""
    c1, c2, cout = p["in_channels1"], p["in_channels2"], p["out_channels"]
    cmid = cout // 4
    c1p, c2p = _round_up(c1, 128), _round_up(c2, 128)
    cmidp, coutp = _round_up(cmid, 128), _round_up(cout, 128)

    def fold_pad(bn, cpad):
        s, b = fold_bn(*bn)
        s = jnp.pad(s, (0, cpad - s.shape[0])).reshape(1, cpad).astype(jnp.float32)
        b = jnp.pad(b, (0, cpad - b.shape[0])).reshape(1, cpad).astype(jnp.float32)
        return s, b

    prep = dict(stride=stride, c1=c1, c2=c2, cout=cout, cmid=cmid,
                c1p=c1p, c2p=c2p, cmidp=cmidp, coutp=coutp,
                has_shortcut=(stride != 1 or c1 != cout))

    # residual 1x1 on cat([x_up, skip]) -> split into two weights (concat-free)
    w1 = jnp.transpose(p["w1"][:, :, 0, 0], (1, 0))            # (c1+c2, cmid)
    prep["w1a"] = _pad2(w1[:c1], c1p, cmidp).astype(jnp.bfloat16)
    prep["w1b"] = _pad2(w1[c1:], c2p, cmidp).astype(jnp.bfloat16)
    prep["s1"], prep["b1"] = fold_pad(p["bn1"], cmidp)

    # residual 3x3 (padding=1, stride) as im2col matmul weight, tap-major rows
    w2 = jnp.transpose(p["w2"], (2, 3, 1, 0))                  # (3, 3, cmid, cmid)
    w2 = jnp.pad(w2, ((0, 0), (0, 0), (0, cmidp - cmid), (0, cmidp - cmid)))
    prep["w2"] = w2.reshape(9 * cmidp, cmidp).astype(jnp.bfloat16)
    prep["s2"], prep["b2"] = fold_pad(p["bn2"], cmidp)

    # residual final 1x1
    w3 = jnp.transpose(p["w3"][:, :, 0, 0], (1, 0))            # (cmid, cout)
    prep["w3"] = _pad2(w3, cmidp, coutp).astype(jnp.bfloat16)
    prep["s3"], prep["b3"] = fold_pad(p["bn3"], coutp)

    if prep["has_shortcut"]:
        wsc = jnp.transpose(p["w_sc"][:, :, 0, 0], (1, 0))     # (c1, cout)
        prep["w_sc"] = _pad2(wsc, c1p, coutp).astype(jnp.bfloat16)
        prep["s_sc"], prep["b_sc"] = fold_pad(p["bn_sc"], coutp)
    return prep


# ------------------------------ JAX glue ----------------------------------- #

def im2col_3x3(x_nhwc, stride):
    """3x3, padding=1 patches; patch order (kh, kw, cin) matching the weight layout."""
    n, h, w, c = x_nhwc.shape
    xp = jnp.pad(x_nhwc, ((0, 0), (1, 1), (1, 1), (0, 0)))
    ho = (h - 1) // stride + 1
    wo = (w - 1) // stride + 1
    lim_h = stride * (ho - 1) + 1
    lim_w = stride * (wo - 1) + 1
    patches = [xp[:, dy:dy + lim_h:stride, dx:dx + lim_w:stride, :]
               for dy in range(3) for dx in range(3)]
    return jnp.concatenate(patches, axis=-1), ho, wo  # (N, Ho, Wo, 9*C), bf16


def bottleneck_skip_forward(prep, x_nchw, skip_nchw):
    """Matches BottleneckSkip.forward(x, skip), mode='bilinear', eval-mode BN."""
    n = x_nchw.shape[0]
    hs, ws = skip_nchw.shape[2], skip_nchw.shape[3]
    stride = prep["stride"]
    c1, c1p, c2p = prep["c1"], prep["c1p"], prep["c2p"]
    cmidp, coutp, cout = prep["cmidp"], prep["coutp"], prep["cout"]

    # NCHW -> NHWC
    x = jnp.transpose(x_nchw, (0, 2, 3, 1))
    skip = jnp.transpose(skip_nchw, (0, 2, 3, 1))

    # F.upsample(x, size=skip.size()[2:], mode='bilinear') (align_corners=False)
    x_up = jax.image.resize(x, (n, hs, ws, c1), method="bilinear")

    # bf16, lane-dense (channel-padded) activations
    x_up = _pad_last(x_up.astype(jnp.bfloat16), c1p)
    skip = _pad_last(skip.astype(jnp.bfloat16), c2p)

    # ---- shortcut branch: 1x1 conv (stride) + BN, or identity ----
    xs = x_up[:, ::stride, ::stride, :]
    ho, wo = xs.shape[1], xs.shape[2]
    m_out = n * ho * wo
    if prep["has_shortcut"]:
        shortcut2d = matmul_bn_act(xs.reshape(m_out, c1p), prep["w_sc"],
                                   prep["s_sc"], prep["b_sc"])
    else:
        shortcut2d = xs.reshape(m_out, coutp)   # c1 == cout here, so c1p == coutp

    # ---- residual branch: 1x1 on cat([x_up, skip]) done as two fused matmuls ----
    m_in = n * hs * ws
    y1 = dual_matmul_bn_relu(x_up.reshape(m_in, c1p), skip.reshape(m_in, c2p),
                             prep["w1a"], prep["w1b"], prep["s1"], prep["b1"])
    y1 = y1.reshape(n, hs, ws, cmidp)

    # 3x3 conv (pad=1, stride) via bf16 im2col + K-tiled matmul.
    # TODO(synk): fuse the 9 taps into the kernel (shifted index_map windows) to
    # avoid materializing the im2col buffer in HBM.
    cols, _, _ = im2col_3x3(y1, stride)
    y2 = matmul_bn_act(cols.reshape(m_out, 9 * cmidp), prep["w2"],
                       prep["s2"], prep["b2"], relu=True)

    # final 1x1 conv + BN fused with the shortcut add and the outer ReLU (f32 out)
    out2d = matmul_bn_act(y2, prep["w3"], prep["s3"], prep["b3"],
                          add=shortcut2d, relu=True, out_dtype=jnp.float32)

    out = out2d.reshape(n, ho, wo, coutp)[..., :cout]
    return jnp.transpose(out, (0, 3, 1, 2))  # back to NCHW


# --------------------------- pure-JAX reference ----------------------------- #

def _ref_forward(params, x_nchw, skip_nchw, stride=1):
    n, c1, _, _ = x_nchw.shape
    _, c2, hs, ws = skip_nchw.shape
    cout = params["out_channels"]
    dn = ("NHWC", "HWIO", "NHWC")

    x = jnp.transpose(x_nchw, (0, 2, 3, 1))
    skip = jnp.transpose(skip_nchw, (0, 2, 3, 1))
    x_up = jax.image.resize(x, (n, hs, ws, c1), method="bilinear")

    def conv(v, w, s, pad):
        w_hwio = jnp.transpose(w, (2, 3, 1, 0))
        return jax.lax.conv_general_dilated(
            v, w_hwio, (s, s), pad, dimension_numbers=dn,
            precision=jax.lax.Precision.HIGHEST)

    def bn(v, p):
        sc, bi = fold_bn(*p)
        return v * sc + bi

    if stride != 1 or c1 != cout:
        sc = bn(conv(x_up, params["w_sc"], stride, "VALID"), params["bn_sc"])
    else:
        sc = x_up[:, ::stride, ::stride, :]

    cat = jnp.concatenate([x_up, skip], axis=-1)
    r = jax.nn.relu(bn(conv(cat, params["w1"], 1, "VALID"), params["bn1"]))
    r = jax.nn.relu(bn(conv(r, params["w2"], stride, [(1, 1), (1, 1)]), params["bn2"]))
    r = bn(conv(r, params["w3"], 1, "VALID"), params["bn3"])
    out = jax.nn.relu(sc + r)
    return jnp.transpose(out, (0, 3, 1, 2))


# --------------------------------- main ------------------------------------- #

if __name__ == "__main__":
    key = jax.random.PRNGKey(0)
    keys = jax.random.split(key, 10)

    # Small shapes consistent with the module:
    N, C1, C2, Cout, stride = 2, 8, 8, 16, 1
    H1 = W1 = 8          # x spatial (bilinearly upsampled to skip's spatial size)
    Hs = Ws = 16         # skip spatial
    Cmid = Cout // 4

    def bn_params(k, c):
        k1, k2, k3, k4 = jax.random.split(k, 4)
        gamma = jax.random.uniform(k1, (c,), jnp.float32, 0.5, 1.5)
        beta = 0.1 * jax.random.normal(k2, (c,), jnp.float32)
        mean = 0.1 * jax.random.normal(k3, (c,), jnp.float32)
        var = jax.random.uniform(k4, (c,), jnp.float32, 0.5, 1.5)
        return gamma, beta, mean, var

    params = {
        "in_channels1": C1, "in_channels2": C2, "out_channels": Cout,
        # shortcut: Conv2d(C1, Cout, 1, stride, bias=False) + BatchNorm2d(Cout)
        "w_sc": 0.1 * jax.random.normal(keys[0], (Cout, C1, 1, 1), jnp.float32),
        "bn_sc": bn_params(keys[1], Cout),
        # residual: 1x1 (C1+C2 -> Cmid), 3x3 (Cmid -> Cmid, pad=1, stride), 1x1 (Cmid -> Cout)
        "w1": 0.1 * jax.random.normal(keys[2], (Cmid, C1 + C2, 1, 1), jnp.float32),
        "bn1": bn_params(keys[3], Cmid),
        "w2": 0.1 * jax.random.normal(keys[4], (Cmid, Cmid, 3, 3), jnp.float32),
        "bn2": bn_params(keys[5], Cmid),
        "w3": 0.1 * jax.random.normal(keys[6], (Cout, Cmid, 1, 1), jnp.float32),
        "bn3": bn_params(keys[7], Cout),
    }

    x = jax.random.normal(keys[8], (N, C1, H1, W1), jnp.float32)
    skip = jax.random.normal(keys[9], (N, C2, Hs, Ws), jnp.float32)

    # One-time weight/BN preparation (transposed, folded, padded, bf16).
    prepared = prepare_params(params, stride=stride)
    fwd = jax.jit(lambda a, b: bottleneck_skip_forward(prepared, a, b))

    out = jax.block_until_ready(fwd(x, skip))
    ref = jax.block_until_ready(_ref_forward(params, x, skip, stride=stride))

    assert out.shape == (N, Cout, Hs, Ws), out.shape
    max_err = float(jnp.max(jnp.abs(out - ref)))
    assert jnp.allclose(out, ref, rtol=5e-2, atol=5e-2), max_err
    print("KERNEL_OK")
</pallas_src>

<mosaic_0001>
module attributes {stable_mosaic.version = 11 : i64} {
  func.func @_dual_matmul_bn_relu_kernel(%arg0: i32, %arg1: memref<256x128xbf16, #tpu.memory_space<vmem>>, %arg2: memref<256x128xbf16, #tpu.memory_space<vmem>>, %arg3: memref<128x128xbf16, #tpu.memory_space<vmem>>, %arg4: memref<128x128xbf16, #tpu.memory_space<vmem>>, %arg5: memref<1x128xf32, #tpu.memory_space<vmem>>, %arg6: memref<1x128xf32, #tpu.memory_space<vmem>>, %arg7: memref<256x128xbf16, #tpu.memory_space<vmem>>) attributes {dimension_semantics = [#tpu.dimension_semantics<parallel>], iteration_bounds = array<i64: 2>, scalar_prefetch = 0 : i64, scratch_operands = 0 : i64, tpu.core_type = #tpu.core_type<tc>, window_params = [{transform_indices = @transform_0, window_bounds = array<i64: 256, 128>}, {transform_indices = @transform_1, window_bounds = array<i64: 256, 128>}, {pipeline_mode = #tpu.pipeline_mode<synchronous>, transform_indices = @transform_2, window_bounds = array<i64: 128, 128>}, {pipeline_mode = #tpu.pipeline_mode<synchronous>, transform_indices = @transform_3, window_bounds = array<i64: 128, 128>}, {pipeline_mode = #tpu.pipeline_mode<synchronous>, transform_indices = @transform_4, window_bounds = array<i64: 1, 128>}, {pipeline_mode = #tpu.pipeline_mode<synchronous>, transform_indices = @transform_5, window_bounds = array<i64: 1, 128>}, {transform_indices = @transform_6, window_bounds = array<i64: 256, 128>}]} {
    %c0 = arith.constant 0 : index
    %c0_0 = arith.constant 0 : index
    %0 = vector.load %arg1[%c0, %c0_0] : memref<256x128xbf16, #tpu.memory_space<vmem>>, vector<256x128xbf16>
    %c0_1 = arith.constant 0 : index
    %c0_2 = arith.constant 0 : index
    %1 = vector.load %arg3[%c0_1, %c0_2] : memref<128x128xbf16, #tpu.memory_space<vmem>>, vector<128x128xbf16>
    %cst = arith.constant dense<0.000000e+00> : vector<256x128xf32>
    %2 = tpu.matmul %0, %1, %cst {dimension_numbers = #tpu.dot_dimension_numbers<[1], [0], [0], [1], [0, 0, 1, 1], [], []>} : vector<256x128xbf16>, vector<128x128xbf16>, vector<256x128xf32> -> vector<256x128xf32>
    %c0_3 = arith.constant 0 : index
    %c0_4 = arith.constant 0 : index
    %3 = vector.load %arg2[%c0_3, %c0_4] : memref<256x128xbf16, #tpu.memory_space<vmem>>, vector<256x128xbf16>
    %c0_5 = arith.constant 0 : index
    %c0_6 = arith.constant 0 : index
    %4 = vector.load %arg4[%c0_5, %c0_6] : memref<128x128xbf16, #tpu.memory_space<vmem>>, vector<128x128xbf16>
    %cst_7 = arith.constant dense<0.000000e+00> : vector<256x128xf32>
    %5 = tpu.matmul %3, %4, %cst_7 {dimension_numbers = #tpu.dot_dimension_numbers<[1], [0], [0], [1], [0, 0, 1, 1], [], []>} : vector<256x128xbf16>, vector<128x128xbf16>, vector<256x128xf32> -> vector<256x128xf32>
    %6 = arith.addf %2, %5 : vector<256x128xf32>
    %c0_8 = arith.constant 0 : index
    %c0_9 = arith.constant 0 : index
    %7 = vector.load %arg5[%c0_8, %c0_9] : memref<1x128xf32, #tpu.memory_space<vmem>>, vector<1x128xf32>
    %8 = vector.broadcast %7 : vector<1x128xf32> to vector<256x128xf32>
    %9 = arith.mulf %6, %8 : vector<256x128xf32>
    %c0_10 = arith.constant 0 : index
    %c0_11 = arith.constant 0 : index
    %10 = vector.load %arg6[%c0_10, %c0_11] : memref<1x128xf32, #tpu.memory_space<vmem>>, vector<1x128xf32>
    %11 = vector.broadcast %10 : vector<1x128xf32> to vector<256x128xf32>
    %12 = arith.addf %9, %11 : vector<256x128xf32>
    %cst_12 = arith.constant 0.000000e+00 : f32
    %13 = vector.broadcast %cst_12 : f32 to vector<256x128xf32>
    %14 = arith.maximumf %12, %13 : vector<256x128xf32>
    %15 = arith.truncf %14 : vector<256x128xf32> to vector<256x128xbf16>
    %c0_13 = arith.constant 0 : index
    %c0_14 = arith.constant 0 : index
    %16 = vector.load %arg7[%c0_13, %c0_14] : memref<256x128xbf16, #tpu.memory_space<vmem>>, vector<256x128xbf16>
    tpu.vector_store %arg7[%c0_13, %c0_14], %15 {strides = array<i32>} : memref<256x128xbf16, #tpu.memory_space<vmem>>, vector<256x128xbf16>,
    return
  }
  func.func @transform_0(%arg0: i32) -> (i32, i32) {
    %c0_i32 = arith.constant 0 : i32
    %c0_i32_0 = arith.constant 0 : i32
    return %arg0, %c0_i32 : i32, i32
  }
  func.func @transform_1(%arg0: i32) -> (i32, i32) {
    %c0_i32 = arith.constant 0 : i32
    %c0_i32_0 = arith.constant 0 : i32
    return %arg0, %c0_i32 : i32, i32
  }
  func.func @transform_2(%arg0: i32) -> (i32, i32) {
    %c0_i32 = arith.constant 0 : i32
    %c0_i32_0 = arith.constant 0 : i32
    %c0_i32_1 = arith.constant 0 : i32
    return %c0_i32, %c0_i32_0 : i32, i32
  }
  func.func @transform_3(%arg0: i32) -> (i32, i32) {
    %c0_i32 = arith.constant 0 : i32
    %c0_i32_0 = arith.constant 0 : i32
    %c0_i32_1 = arith.constant 0 : i32
    return %c0_i32, %c0_i32_0 : i32, i32
  }
  func.func @transform_4(%arg0: i32) -> (i32, i32) {
    %c0_i32 = arith.constant 0 : i32
    %c0_i32_0 = arith.constant 0 : i32
    %c0_i32_1 = arith.constant 0 : i32
    return %c0_i32, %c0_i32_0 : i32, i32
  }
  func.func @transform_5(%arg0: i32) -> (i32, i32) {
    %c0_i32 = arith.constant 0 : i32
    %c0_i32_0 = arith.constant 0 : i32
    %c0_i32_1 = arith.constant 0 : i32
    return %c0_i32, %c0_i32_0 : i32, i32
  }
  func.func @transform_6(%arg0: i32) -> (i32, i32) {
    %c0_i32 = arith.constant 0 : i32
    %c0_i32_0 = arith.constant 0 : i32
    return %arg0, %c0_i32 : i32, i32
  }
}

module attributes {stable_mosaic.version = 11 : i64} {
  func.func @_matmul_bn_kernel(%arg0: i32, %arg1: i32, %arg2: memref<256x128xbf16, #tpu.memory_space<vmem>>, %arg3: memref<128x128xbf16, #tpu.memory_space<vmem>>, %arg4: memref<1x128xf32, #tpu.memory_space<vmem>>, %arg5: memref<1x128xf32, #tpu.memory_space<vmem>>, %arg6: memref<256x128xbf16, #tpu.memory_space<vmem>>, %arg7: memref<256x128xf32, #tpu.memory_space<vmem>>) attributes {dimension_semantics = [#tpu.dimension_semantics<parallel>, #tpu.dimension_semantics<arbitrary>], iteration_bounds = array<i64: 2, 1>, scalar_prefetch = 0 : i64, scratch_operands = 1 : i64, tpu.core_type = #tpu.core_type<tc>, window_params = [{transform_indices = @transform_0, window_bounds = array<i64: 256, 128>}, {transform_indices = @transform_1, window_bounds = array<i64: 128, 128>}, {pipeline_mode = #tpu.pipeline_mode<synchronous>, transform_indices = @transform_2, window_bounds = array<i64: 1, 128>}, {pipeline_mode = #tpu.pipeline_mode<synchronous>, transform_indices = @transform_3, window_bounds = array<i64: 1, 128>}, {transform_indices = @transform_4, window_bounds = array<i64: 256, 128>}]} {
    %c0_i32 = arith.constant 0 : i32
    %0 = arith.cmpi eq, %arg1, %c0_i32 : i32
    %1 = arith.extui %0 : i1 to i32
    %c0_i32_0 = arith.constant 0 : i32
    %2 = arith.cmpi ne, %1, %c0_i32_0 : i32
    scf.if %2 {
      %cst_10 = arith.constant 0.000000e+00 : f32
      %12 = vector.broadcast %cst_10 : f32 to vector<256x128xf32>
      %c0_11 = arith.constant 0 : index
      %c0_12 = arith.constant 0 : index
      %13 = vector.load %arg7[%c0_11, %c0_12] : memref<256x128xf32, #tpu.memory_space<vmem>>, vector<256x128xf32>
      tpu.vector_store %arg7[%c0_11, %c0_12], %12 {strides = array<i32>} : memref<256x128xf32, #tpu.memory_space<vmem>>, vector<256x128xf32>,
    } else {
    }
    %c0 = arith.constant 0 : index
    %c0_1 = arith.constant 0 : index
    %3 = vector.load %arg7[%c0, %c0_1] : memref<256x128xf32, #tpu.memory_space<vmem>>, vector<256x128xf32>
    %c0_2 = arith.constant 0 : index
    %c0_3 = arith.constant 0 : index
    %4 = vector.load %arg2[%c0_2, %c0_3] : memref<256x128xbf16, #tpu.memory_space<vmem>>, vector<256x128xbf16>
    %c0_4 = arith.constant 0 : index
    %c0_5 = arith.constant 0 : index
    %5 = vector.load %arg3[%c0_4, %c0_5] : memref<128x128xbf16, #tpu.memory_space<vmem>>, vector<128x128xbf16>
    %cst = arith.constant dense<0.000000e+00> : vector<256x128xf32>
    %6 = tpu.matmul %4, %5, %cst {dimension_numbers = #tpu.dot_dimension_numbers<[1], [0], [0], [1], [0, 0, 1, 1], [], []>} : vector<256x128xbf16>, vector<128x128xbf16>, vector<256x128xf32> -> vector<256x128xf32>
    %7 = arith.addf %3, %6 : vector<256x128xf32>
    %c0_6 = arith.constant 0 : index
    %c0_7 = arith.constant 0 : index
    %8 = vector.load %arg7[%c0_6, %c0_7] : memref<256x128xf32, #tpu.memory_space<vmem>>, vector<256x128xf32>
    tpu.vector_store %arg7[%c0_6, %c0_7], %7 {strides = array<i32>} : memref<256x128xf32, #tpu.memory_space<vmem>>, vector<256x128xf32>,
    %c0_i32_8 = arith.constant 0 : i32
    %9 = arith.cmpi eq, %arg1, %c0_i32_8 : i32
    %10 = arith.extui %9 : i1 to i32
    %c0_i32_9 = arith.constant 0 : i32
    %11 = arith.cmpi ne, %10, %c0_i32_9 : i32
    scf.if %11 {
      %c0_10 = arith.constant 0 : index
      %c0_11 = arith.constant 0 : index
      %12 = vector.load %arg7[%c0_10, %c0_11] : memref<256x128xf32, #tpu.memory_space<vmem>>, vector<256x128xf32>
      %c0_12 = arith.constant 0 : index
      %c0_13 = arith.constant 0 : index
      %13 = vector.load %arg4[%c0_12, %c0_13] : memref<1x128xf32, #tpu.memory_space<vmem>>, vector<1x128xf32>
      %14 = vector.broadcast %13 : vector<1x128xf32> to vector<256x128xf32>
      %15 = arith.mulf %12, %14 : vector<256x128xf32>
      %c0_14 = arith.constant 0 : index
      %c0_15 = arith.constant 0 : index
      %16 = vector.load %arg5[%c0_14, %c0_15] : memref<1x128xf32, #tpu.memory_space<vmem>>, vector<1x128xf32>
      %17 = vector.broadcast %16 : vector<1x128xf32> to vector<256x128xf32>
      %18 = arith.addf %15, %17 : vector<256x128xf32>
      %19 = arith.truncf %18 : vector<256x128xf32> to vector<256x128xbf16>
      %c0_16 = arith.constant 0 : index
      %c0_17 = arith.constant 0 : index
      %20 = vector.load %arg6[%c0_16, %c0_17] : memref<256x128xbf16, #tpu.memory_space<vmem>>, vector<256x128xbf16>
      tpu.vector_store %arg6[%c0_16, %c0_17], %19 {strides = array<i32>} : memref<256x128xbf16, #tpu.memory_space<vmem>>, vector<256x128xbf16>,
    } else {
    }
    return
  }
  func.func @transform_0(%arg0: i32, %arg1: i32) -> (i32, i32) {
    %c0_i32 = arith.constant 0 : i32
    return %arg0, %arg1 : i32, i32
  }
  func.func @transform_1(%arg0: i32, %arg1: i32) -> (i32, i32) {
    %c0_i32 = arith.constant 0 : i32
    %c0_i32_0 = arith.constant 0 : i32
    return %arg1, %c0_i32 : i32, i32
  }
  func.func @transform_2(%arg0: i32, %arg1: i32) -> (i32, i32) {
    %c0_i32 = arith.constant 0 : i32
    %c0_i32_0 = arith.constant 0 : i32
    %c0_i32_1 = arith.constant 0 : i32
    return %c0_i32, %c0_i32_0 : i32, i32
  }
  func.func @transform_3(%arg0: i32, %arg1: i32) -> (i32, i32) {
    %c0_i32 = arith.constant 0 : i32
    %c0_i32_0 = arith.constant 0 : i32
    %c0_i32_1 = arith.constant 0 : i32
    return %c0_i32, %c0_i32_0 : i32, i32
  }
  func.func @transform_4(%arg0: i32, %arg1: i32) -> (i32, i32) {
    %c0_i32 = arith.constant 0 : i32
    %c0_i32_0 = arith.constant 0 : i32
    return %arg0, %c0_i32 : i32, i32
  }
}

module attributes {stable_mosaic.version = 11 : i64} {
  func.func @_matmul_bn_kernel(%arg0: i32, %arg1: i32, %arg2: memref<256x128xbf16, #tpu.memory_space<vmem>>, %arg3: memref<128x128xbf16, #tpu.memory_space<vmem>>, %arg4: memref<1x128xf32, #tpu.memory_space<vmem>>, %arg5: memref<1x128xf32, #tpu.memory_space<vmem>>, %arg6: memref<256x128xbf16, #tpu.memory_space<vmem>>, %arg7: memref<256x128xf32, #tpu.memory_space<vmem>>) attributes {dimension_semantics = [#tpu.dimension_semantics<parallel>, #tpu.dimension_semantics<arbitrary>], iteration_bounds = array<i64: 2, 9>, scalar_prefetch = 0 : i64, scratch_operands = 1 : i64, tpu.core_type = #tpu.core_type<tc>, window_params = [{transform_indices = @transform_0, window_bounds = array<i64: 256, 128>}, {transform_indices = @transform_1, window_bounds = array<i64: 128, 128>}, {pipeline_mode = #tpu.pipeline_mode<synchronous>, transform_indices = @transform_2, window_bounds = array<i64: 1, 128>}, {pipeline_mode = #tpu.pipeline_mode<synchronous>, transform_indices = @transform_3, window_bounds = array<i64: 1, 128>}, {transform_indices = @transform_4, window_bounds = array<i64: 256, 128>}]} {
    %c0_i32 = arith.constant 0 : i32
    %0 = arith.cmpi eq, %arg1, %c0_i32 : i32
    %1 = arith.extui %0 : i1 to i32
    %c0_i32_0 = arith.constant 0 : i32
    %2 = arith.cmpi ne, %1, %c0_i32_0 : i32
    scf.if %2 {
      %cst_9 = arith.constant 0.000000e+00 : f32
      %12 = vector.broadcast %cst_9 : f32 to vector<256x128xf32>
      %c0_10 = arith.constant 0 : index
      %c0_11 = arith.constant 0 : index
      %13 = vector.load %arg7[%c0_10, %c0_11] : memref<256x128xf32, #tpu.memory_space<vmem>>, vector<256x128xf32>
      tpu.vector_store %arg7[%c0_10, %c0_11], %12 {strides = array<i32>} : memref<256x128xf32, #tpu.memory_space<vmem>>, vector<256x128xf32>,
    } else {
    }
    %c0 = arith.constant 0 : index
    %c0_1 = arith.constant 0 : index
    %3 = vector.load %arg7[%c0, %c0_1] : memref<256x128xf32, #tpu.memory_space<vmem>>, vector<256x128xf32>
    %c0_2 = arith.constant 0 : index
    %c0_3 = arith.constant 0 : index
    %4 = vector.load %arg2[%c0_2, %c0_3] : memref<256x128xbf16, #tpu.memory_space<vmem>>, vector<256x128xbf16>
    %c0_4 = arith.constant 0 : index
    %c0_5 = arith.constant 0 : index
    %5 = vector.load %arg3[%c0_4, %c0_5] : memref<128x128xbf16, #tpu.memory_space<vmem>>, vector<128x128xbf16>
    %cst = arith.constant dense<0.000000e+00> : vector<256x128xf32>
    %6 = tpu.matmul %4, %5, %cst {dimension_numbers = #tpu.dot_dimension_numbers<[1], [0], [0], [1], [0, 0, 1, 1], [], []>} : vector<256x128xbf16>, vector<128x128xbf16>, vector<256x128xf32> -> vector<256x128xf32>
    %7 = arith.addf %3, %6 : vector<256x128xf32>
    %c0_6 = arith.constant 0 : index
    %c0_7 = arith.constant 0 : index
    %8 = vector.load %arg7[%c0_6, %c0_7] : memref<256x128xf32, #tpu.memory_space<vmem>>, vector<256x128xf32>
    tpu.vector_store %arg7[%c0_6, %c0_7], %7 {strides = array<i32>} : memref<256x128xf32, #tpu.memory_space<vmem>>, vector<256x128xf32>,
    %c8_i32 = arith.constant 8 : i32
    %9 = arith.cmpi eq, %arg1, %c8_i32 : i32
    %10 = arith.extui %9 : i1 to i32
    %c0_i32_8 = arith.constant 0 : i32
    %11 = arith.cmpi ne, %10, %c0_i32_8 : i32
    scf.if %11 {
      %c0_9 = arith.constant 0 : index
      %c0_10 = arith.constant 0 : index
      %12 = vector.load %arg7[%c0_9, %c0_10] : memref<256x128xf32, #tpu.memory_space<vmem>>, vector<256x128xf32>
      %c0_11 = arith.constant 0 : index
      %c0_12 = arith.constant 0 : index
      %13 = vector.load %arg4[%c0_11, %c0_12] : memref<1x128xf32, #tpu.memory_space<vmem>>, vector<1x128xf32>
      %14 = vector.broadcast %13 : vector<1x128xf32> to vector<256x128xf32>
      %15 = arith.mulf %12, %14 : vector<256x128xf32>
      %c0_13 = arith.constant 0 : index
      %c0_14 = arith.constant 0 : index
      %16 = vector.load %arg5[%c0_13, %c0_14] : memref<1x128xf32, #tpu.memory_space<vmem>>, vector<1x128xf32>
      %17 = vector.broadcast %16 : vector<1x128xf32> to vector<256x128xf32>
      %18 = arith.addf %15, %17 : vector<256x128xf32>
      %cst_15 = arith.constant 0.000000e+00 : f32
      %19 = vector.broadcast %cst_15 : f32 to vector<256x128xf32>
      %20 = arith.maximumf %18, %19 : vector<256x128xf32>
      %21 = arith.truncf %20 : vector<256x128xf32> to vector<256x128xbf16>
      %c0_16 = arith.constant 0 : index
      %c0_17 = arith.constant 0 : index
      %22 = vector.load %arg6[%c0_16, %c0_17] : memref<256x128xbf16, #tpu.memory_space<vmem>>, vector<256x128xbf16>
      tpu.vector_store %arg6[%c0_16, %c0_17], %21 {strides = array<i32>} : memref<256x128xbf16, #tpu.memory_space<vmem>>, vector<256x128xbf16>,
    } else {
    }
    return
  }
  func.func @transform_0(%arg0: i32, %arg1: i32) -> (i32, i32) {
    %c0_i32 = arith.constant 0 : i32
    return %arg0, %arg1 : i32, i32
  }
  func.func @transform_1(%arg0: i32, %arg1: i32) -> (i32, i32) {
    %c0_i32 = arith.constant 0 : i32
    %c0_i32_0 = arith.constant 0 : i32
    return %arg1, %c0_i32 : i32, i32
  }
  func.func @transform_2(%arg0: i32, %arg1: i32) -> (i32, i32) {
    %c0_i32 = arith.constant 0 : i32
    %c0_i32_0 = arith.constant 0 : i32
    %c0_i32_1 = arith.constant 0 : i32
    return %c0_i32, %c0_i32_0 : i32, i32
  }
  func.func @transform_3(%arg0: i32, %arg1: i32) -> (i32, i32) {
    %c0_i32 = arith.constant 0 : i32
    %c0_i32_0 = arith.constant 0 : i32
    %c0_i32_1 = arith.constant 0 : i32
    return %c0_i32, %c0_i32_0 : i32, i32
  }
  func.func @transform_4(%arg0: i32, %arg1: i32) -> (i32, i32) {
    %c0_i32 = arith.constant 0 : i32
    %c0_i32_0 = arith.constant 0 : i32
    return %arg0, %c0_i32 : i32, i32
  }
}

module attributes {stable_mosaic.version = 11 : i64} {
  func.func @_matmul_bn_kernel(%arg0: i32, %arg1: i32, %arg2: memref<256x128xbf16, #tpu.memory_space<vmem>>, %arg3: memref<128x128xbf16, #tpu.memory_space<vmem>>, %arg4: memref<1x128xf32, #tpu.memory_space<vmem>>, %arg5: memref<1x128xf32, #tpu.memory_space<vmem>>, %arg6: memref<256x128xbf16, #tpu.memory_space<vmem>>, %arg7: memref<256x128xf32, #tpu.memory_space<vmem>>, %arg8: memref<256x128xf32, #tpu.memory_space<vmem>>) attributes {dimension_semantics = [#tpu.dimension_semantics<parallel>, #tpu.dimension_semantics<arbitrary>], iteration_bounds = array<i64: 2, 1>, scalar_prefetch = 0 : i64, scratch_operands = 1 : i64, tpu.core_type = #tpu.core_type<tc>, window_params = [{transform_indices = @transform_0, window_bounds = array<i64: 256, 128>}, {transform_indices = @transform_1, window_bounds = array<i64: 128, 128>}, {pipeline_mode = #tpu.pipeline_mode<synchronous>, transform_indices = @transform_2, window_bounds = array<i64: 1, 128>}, {pipeline_mode = #tpu.pipeline_mode<synchronous>, transform_indices = @transform_3, window_bounds = array<i64: 1, 128>}, {transform_indices = @transform_4, window_bounds = array<i64: 256, 128>}, {transform_indices = @transform_5, window_bounds = array<i64: 256, 128>}]} {
    %c0_i32 = arith.constant 0 : i32
    %0 = arith.cmpi eq, %arg1, %c0_i32 : i32
    %1 = arith.extui %0 : i1 to i32
    %c0_i32_0 = arith.constant 0 : i32
    %2 = arith.cmpi ne, %1, %c0_i32_0 : i32
    scf.if %2 {
      %cst_10 = arith.constant 0.000000e+00 : f32
      %12 = vector.broadcast %cst_10 : f32 to vector<256x128xf32>
      %c0_11 = arith.constant 0 : index
      %c0_12 = arith.constant 0 : index
      %13 = vector.load %arg8[%c0_11, %c0_12] : memref<256x128xf32, #tpu.memory_space<vmem>>, vector<256x128xf32>
      tpu.vector_store %arg8[%c0_11, %c0_12], %12 {strides = array<i32>} : memref<256x128xf32, #tpu.memory_space<vmem>>, vector<256x128xf32>,
    } else {
    }
    %c0 = arith.constant 0 : index
    %c0_1 = arith.constant 0 : index
    %3 = vector.load %arg8[%c0, %c0_1] : memref<256x128xf32, #tpu.memory_space<vmem>>, vector<256x128xf32>
    %c0_2 = arith.constant 0 : index
    %c0_3 = arith.constant 0 : index
    %4 = vector.load %arg2[%c0_2, %c0_3] : memref<256x128xbf16, #tpu.memory_space<vmem>>, vector<256x128xbf16>
    %c0_4 = arith.constant 0 : index
    %c0_5 = arith.constant 0 : index
    %5 = vector.load %arg3[%c0_4, %c0_5] : memref<128x128xbf16, #tpu.memory_space<vmem>>, vector<128x128xbf16>
    %cst = arith.constant dense<0.000000e+00> : vector<256x128xf32>
    %6 = tpu.matmul %4, %5, %cst {dimension_numbers = #tpu.dot_dimension_numbers<[1], [0], [0], [1], [0, 0, 1, 1], [], []>} : vector<256x128xbf16>, vector<128x128xbf16>, vector<256x128xf32> -> vector<256x128xf32>
    %7 = arith.addf %3, %6 : vector<256x128xf32>
    %c0_6 = arith.constant 0 : index
    %c0_7 = arith.constant 0 : index
    %8 = vector.load %arg8[%c0_6, %c0_7] : memref<256x128xf32, #tpu.memory_space<vmem>>, vector<256x128xf32>
    tpu.vector_store %arg8[%c0_6, %c0_7], %7 {strides = array<i32>} : memref<256x128xf32, #tpu.memory_space<vmem>>, vector<256x128xf32>,
    %c0_i32_8 = arith.constant 0 : i32
    %9 = arith.cmpi eq, %arg1, %c0_i32_8 : i32
    %10 = arith.extui %9 : i1 to i32
    %c0_i32_9 = arith.constant 0 : i32
    %11 = arith.cmpi ne, %10, %c0_i32_9 : i32
    scf.if %11 {
      %c0_10 = arith.constant 0 : index
      %c0_11 = arith.constant 0 : index
      %12 = vector.load %arg8[%c0_10, %c0_11] : memref<256x128xf32, #tpu.memory_space<vmem>>, vector<256x128xf32>
      %c0_12 = arith.constant 0 : index
      %c0_13 = arith.constant 0 : index
      %13 = vector.load %arg4[%c0_12, %c0_13] : memref<1x128xf32, #tpu.memory_space<vmem>>, vector<1x128xf32>
      %14 = vector.broadcast %13 : vector<1x128xf32> to vector<256x128xf32>
      %15 = arith.mulf %12, %14 : vector<256x128xf32>
      %c0_14 = arith.constant 0 : index
      %c0_15 = arith.constant 0 : index
      %16 = vector.load %arg5[%c0_14, %c0_15] : memref<1x128xf32, #tpu.memory_space<vmem>>, vector<1x128xf32>
      %17 = vector.broadcast %16 : vector<1x128xf32> to vector<256x128xf32>
      %18 = arith.addf %15, %17 : vector<256x128xf32>
      %c0_16 = arith.constant 0 : index
      %c0_17 = arith.constant 0 : index
      %19 = vector.load %arg6[%c0_16, %c0_17] : memref<256x128xbf16, #tpu.memory_space<vmem>>, vector<256x128xbf16>
      %20 = arith.extf %19 : vector<256x128xbf16> to vector<256x128xf32>
      %21 = arith.addf %18, %20 : vector<256x128xf32>
      %cst_18 = arith.constant 0.000000e+00 : f32
      %22 = vector.broadcast %cst_18 : f32 to vector<256x128xf32>
      %23 = arith.maximumf %21, %22 : vector<256x128xf32>
      %c0_19 = arith.constant 0 : index
      %c0_20 = arith.constant 0 : index
      %24 = vector.load %arg7[%c0_19, %c0_20] : memref<256x128xf32, #tpu.memory_space<vmem>>, vector<256x128xf32>
      tpu.vector_store %arg7[%c0_19, %c0_20], %23 {strides = array<i32>} : memref<256x128xf32, #tpu.memory_space<vmem>>, vector<256x128xf32>,
    } else {
    }
    return
  }
  func.func @transform_0(%arg0: i32, %arg1: i32) -> (i32, i32) {
    %c0_i32 = arith.constant 0 : i32
    return %arg0, %arg1 : i32, i32
  }
  func.func @transform_1(%arg0: i32, %arg1: i32) -> (i32, i32) {
    %c0_i32 = arith.constant 0 : i32
    %c0_i32_0 = arith.constant 0 : i32
    return %arg1, %c0_i32 : i32, i32
  }
  func.func @transform_2(%arg0: i32, %arg1: i32) -> (i32, i32) {
    %c0_i32 = arith.constant 0 : i32
    %c0_i32_0 = arith.constant 0 : i32
    %c0_i32_1 = arith.constant 0 : i32
    return %c0_i32, %c0_i32_0 : i32, i32
  }
  func.func @transform_3(%arg0: i32, %arg1: i32) -> (i32, i32) {
    %c0_i32 = arith.constant 0 : i32
    %c0_i32_0 = arith.constant 0 : i32
    %c0_i32_1 = arith.constant 0 : i32
    return %c0_i32, %c0_i32_0 : i32, i32
  }
  func.func @transform_4(%arg0: i32, %arg1: i32) -> (i32, i32) {
    %c0_i32 = arith.constant 0 : i32
    %c0_i32_0 = arith.constant 0 : i32
    return %arg0, %c0_i32 : i32, i32
  }
  func.func @transform_5(%arg0: i32, %arg1: i32) -> (i32, i32) {
    %c0_i32 = arith.constant 0 : i32
    %c0_i32_0 = arith.constant 0 : i32
    return %arg0, %c0_i32 : i32, i32
  }
}

</mosaic_0001>

<bundles_post_ra>
// kernel: _lambda_.5
= control target key start
LH: loop header
LB: loop body
LE: loop exit
PB: predicated region body
PF: predicated region fallthrough
CT: control target
= control target key end

     0   :  { %s1819_s21 = smov 0   ;;  %s2020_s0 = inlined_call_operand.vmem [shape: bf16[512,128], index: 0, kind: input, shape index: {}]   ;;  %s2021_s1 = inlined_call_operand.vmem [shape: bf16[512,128], index: 1, kind: input, shape index: {}]   ;;  %s2022_s2 = inlined_call_operand.vmem [shape: bf16[128,128], index: 2, kind: input, shape index: {}]   ;;  %s2023_s3 = inlined_call_operand.vmem [shape: bf16[128,128], index: 3, kind: input, shape index: {}]   ;;  %s2024_s4 = inlined_call_operand.vmem [shape: f32[1,128], index: 4, kind: input, shape index: {}]   ;;  %s2025_s5 = inlined_call_operand.vmem [shape: f32[1,128], index: 5, kind: input, shape index: {}]   ;;  %s2026_s6 = inlined_call_operand.vmem [shape: bf16[512,128], index: 6, kind: output, shape index: {}]  }
   0x1 LB: > { %s1322_s22 = sadd.s32 4294967295, %s1782_s21   ;;  %p1326_p0 = scmp.ge.s32.totalorder %s1782_s21, 1  ;;  %s1782_s21 = sphi %s1819_s21, %s16_s21  }
   0x2   : > { %p224_p1 = scmp.lt.s32.totalorder %s1782_s21, 3 }
   0x4   : > { %p225_p2 = pnand %p1326_p0, %p224_p1 }
   0x5   : > { %v1728_v0 = vld [vmem:[%s2023_s3] sm:$0xff] (!%p225_p2)   ;;  %s1327_s25 = sshll.u32 (!%p225_p2), %s1322_s22, 5  ;;  %v1730_v2 = vld [vmem:[%s2023_s3 + $0x8] sm:$0xff] (!%p225_p2)   ;;  %v1732_v4 = vld [vmem:[%s2023_s3 + $0x10] sm:$0xff] (!%p225_p2)  }
   0x6   : > { %228 = sbr.rel (%p225_p2) target bundleno = 321 (0x141), region = 44  ;;  %v1729_v1 = vld [vmem:[%s2022_s2] sm:$0xff] (!%p225_p2)   ;;  %1592 = vmatprep.subr.bf16.mxu1 (!%p225_p2), %v1728_v0  ;;  %p260_p3 = scmp.lt.s32.totalorder (!%p225_p2), %s1327_s25, 63  ;;  %v1731_v3 = vld [vmem:[%s2022_s2 + $0x8] sm:$0xff] (!%p225_p2)   ;;  %v1733_v5 = vld [vmem:[%s2022_s2 + $0x10] sm:$0xff] (!%p225_p2)  }
   0x7   : > { %1640 = vmatprep.subr.bf16.mxu0 (!%p225_p2), %v1729_v1  ;;  %1593 = vmatpush3.bf16.msra.mxu1 (!%p225_p2), %v1728_v0  ;;  %v1734_v6 = vld [vmem:[%s2023_s3 + $0x18] sm:$0xff] (!%p225_p2)   ;;  %v1736_v8 = vld [vmem:[%s2023_s3 + $0x20] sm:$0xff] (!%p225_p2)   ;;  %v1738_v10 = vld [vmem:[%s2023_s3 + $0x28] sm:$0xff] (!%p225_p2)  }
   0x8   : > { %1641 = vmatpush3.bf16.msra.mxu0 (!%p225_p2), %v1729_v1  ;;  %1594 = vmatprep.subr.bf16.mxu1 (!%p225_p2), %v1730_v2  ;;  %v1735_v7 = vld [vmem:[%s2022_s2 + $0x18] sm:$0xff] (!%p225_p2)   ;;  %v1737_v9 = vld [vmem:[%s2022_s2 + $0x20] sm:$0xff] (!%p225_p2)   ;;  %v1739_v11 = vld [vmem:[%s2022_s2 + $0x28] sm:$0xff] (!%p225_p2)  }
   0x9   : > { %1642 = vmatprep.subr.bf16.mxu0 (!%p225_p2), %v1731_v3  ;;  %v1740_v14 = vld [vmem:[%s2023_s3 + $0x30] sm:$0xff] (!%p225_p2)   ;;  %v1742_v16 = vld [vmem:[%s2023_s3 + $0x38] sm:$0xff] (!%p225_p2)   ;;  %v1924_v50 = vld [vmem:[%s2024_s4] ss:$0 sm:$0xff] (!%p225_p2) }
   0xa   : > { %v1741_v15 = vld [vmem:[%s2022_s2 + $0x30] sm:$0xff] (!%p225_p2)   ;;  %v1743_v17 = vld [vmem:[%s2022_s2 + $0x38] sm:$0xff] (!%p225_p2)   ;;  %v1929_v55 = vld [vmem:[%s2025_s5] ss:$0 sm:$0xff] (!%p225_p2) }
   0xb   : > { %1595 = vmatpush3.bf16.msra.mxu1 (!%p225_p2), %v1730_v2 }
   0xc   : > { %1643 = vmatpush3.bf16.msra.mxu0 (!%p225_p2), %v1731_v3  ;;  %1596 = vmatprep.subr.bf16.mxu1 (!%p225_p2), %v1732_v4 }
   0xd   : > { %s2028_s25 = smov (!%p260_p3, %s1327_s25), 63  ;;  %1644 = vmatprep.subr.bf16.mxu0 %v1733_v5 }
   0xe   : > { %s1851_s16 = sshll.u32 %s2028_s25, 2 }
   0xf   : > { %1597 = vmatpush3.bf16.msra.mxu1 %v1732_v4  ;;  %s1863_s24 = scalar_lea.vmem %s2021_s1, %s1851_s16  ;;  %s1872_s29 = scalar_lea.vmem %s2020_s0, %s1851_s16 }
  0x10   : > { %1645 = vmatpush3.bf16.msra.mxu0 %v1733_v5  ;;  %1598 = vmatprep.subr.bf16.mxu1 %v1734_v6  ;;  %v1744_v12 = vld [vmem:[%s1863_s24] sm:$0xff]   ;;  %v1746_v18 = vld [vmem:[%s1863_s24 + $0x8] sm:$0xff]   ;;  %v1748_v20 = vld [vmem:[%s1863_s24 + $0x10] sm:$0xff]  }
  0x11   : > { %1646 = vmatprep.subr.bf16.mxu0 %v1735_v7  ;;  %v1745_v13 = vld [vmem:[%s1872_s29] sm:$0xff]   ;;  %1608 = vmatprep.mubr.bf16.mxu1 %v1744_v12  ;;  %v1747_v19 = vld [vmem:[%s1872_s29 + $0x8] sm:$0xff]   ;;  %v1749_v21 = vld [vmem:[%s1872_s29 + $0x10] sm:$0xff]  }
  0x12   : > { %1656 = vmatprep.mubr.bf16.mxu0 %v1745_v13  ;;  %v1750_v22 = vld [vmem:[%s1863_s24 + $0x18] sm:$0xff]   ;;  %v1752_v24 = vld [vmem:[%s1863_s24 + $0x20] sm:$0xff]   ;;  %v1754_v26 = vld [vmem:[%s1863_s24 + $0x28] sm:$0xff]  }
  0x13   : > { %1599 = vmatpush3.bf16.msra.mxu1 %v1734_v6  ;;  %v1751_v23 = vld [vmem:[%s1872_s29 + $0x18] sm:$0xff]   ;;  %v1753_v25 = vld [vmem:[%s1872_s29 + $0x20] sm:$0xff]   ;;  %v1755_v27 = vld [vmem:[%s1872_s29 + $0x28] sm:$0xff]  }
  0x14   : > { %1647 = vmatpush3.bf16.msra.mxu0 %v1735_v7  ;;  %1600 = vmatprep.subr.bf16.mxu1 %v1736_v8  ;;  %v1756_v28 = vld [vmem:[%s1863_s24 + $0x30] sm:$0xff]   ;;  %v1758_v30 = vld [vmem:[%s1863_s24 + $0x38] sm:$0xff]   ;;  %v1760_v32 = vld [vmem:[%s1863_s24 + $0x40] sm:$0xff]  }
  0x15   : > { %1648 = vmatprep.subr.bf16.mxu0 %v1737_v9  ;;  %v1757_v29 = vld [vmem:[%s1872_s29 + $0x30] sm:$0xff]   ;;  %v1759_v31 = vld [vmem:[%s1872_s29 + $0x38] sm:$0xff]   ;;  %v1761_v33 = vld [vmem:[%s1872_s29 + $0x40] sm:$0xff]  }
  0x16   : > { %v1762_v34 = vld [vmem:[%s1863_s24 + $0x48] sm:$0xff]   ;;  %v1764_v36 = vld [vmem:[%s1863_s24 + $0x50] sm:$0xff]   ;;  %v1766_v38 = vld [vmem:[%s1863_s24 + $0x58] sm:$0xff]  }
  0x17   : > { %1601 = vmatpush3.bf16.msra.mxu1 %v1736_v8  ;;  %v1763_v35 = vld [vmem:[%s1872_s29 + $0x48] sm:$0xff]   ;;  %v1765_v37 = vld [vmem:[%s1872_s29 + $0x50] sm:$0xff]   ;;  %v1767_v39 = vld [vmem:[%s1872_s29 + $0x58] sm:$0xff]  }
  0x18   : > { %1649 = vmatpush3.bf16.msra.mxu0 %v1737_v9  ;;  %1602 = vmatprep.subr.bf16.mxu1 %v1738_v10  ;;  %v1768_v40 = vld [vmem:[%s1863_s24 + $0x60] sm:$0xff]   ;;  %v1770_v42 = vld [vmem:[%s1863_s24 + $0x68] sm:$0xff]   ;;  %v1772_v44 = vld [vmem:[%s1863_s24 + $0x70] sm:$0xff]  }
  0x19   : > { %1650 = vmatprep.subr.bf16.mxu0 %v1739_v11  ;;  %v1769_v41 = vld [vmem:[%s1872_s29 + $0x60] sm:$0xff]   ;;  %v1771_v43 = vld [vmem:[%s1872_s29 + $0x68] sm:$0xff]   ;;  %v1773_v45 = vld [vmem:[%s1872_s29 + $0x70] sm:$0xff]  }
  0x1a   : > { %v1774_v46 = vld [vmem:[%s1863_s24 + $0x78] sm:$0xff]   ;;  %s1943_s24 = scalar_lea.vmem %s2026_s6, %s1851_s16 }
  0x1b   : > { %1603 = vmatpush3.bf16.msra.mxu1 %v1738_v10  ;;  %v1775_v47 = vld [vmem:[%s1872_s29 + $0x78] sm:$0xff]  }
  0x1c   : > { %1651 = vmatpush3.bf16.msra.mxu0 %v1739_v11  ;;  %1604 = vmatprep.subr.bf16.mxu1 %v1740_v14 }
  0x1d   : > { %1652 = vmatprep.subr.bf16.mxu0 %v1741_v15 }
  0x1f   : > { %1605 = vmatpush3.bf16.msra.mxu1 %v1740_v14 }
  0x20   : > { %1653 = vmatpush3.bf16.msra.mxu0 %v1741_v15  ;;  %1606 = vmatprep.subr.bf16.mxu1 %v1742_v16 }
  0x21   : > { %1654 = vmatprep.subr.bf16.mxu0 %v1743_v17 }
  0x23   : > { %1607 = vmatpush3.bf16.msra.mxu1 %v1742_v16 }
  0x24   : > { %1655 = vmatpush3.bf16.msra.mxu0 %v1743_v17 }
  0x26   : > { %1609 = vmatmul.mubr.bf16.vlgmr.msra.gmra.mrb[0].mxu1 %v1746_v18 }
  0x27   : > { %1657 = vmatmul.mubr.bf16.vlgmr.msra.gmra.mrb[0].mxu0 %v1747_v19  ;;  %1612 = vmatprep.mubr.bf16.mxu1 %v1748_v20 }
  0x28   : > { %1660 = vmatprep.mubr.bf16.mxu0 %v1749_v21 }
  0x2e   : > { %1613 = vmatmul.mubr.bf16.gmra.mrb[4].mxu1 %v1750_v22 }
  0x2f   : > { %1661 = vmatmul.mubr.bf16.gmra.mrb[4].mxu0 %v1751_v23  ;;  %1616 = vmatprep.mubr.bf16.mxu1 %v1752_v24 }
  0x30   : > { %1664 = vmatprep.mubr.bf16.mxu0 %v1753_v25 }
  0x36   : > { %1617 = vmatmul.mubr.bf16.gmra.mrb[8].mxu1 %v1754_v26 }
  0x37   : > { %1665 = vmatmul.mubr.bf16.gmra.mrb[8].mxu0 %v1755_v27  ;;  %1620 = vmatprep.mubr.bf16.mxu1 %v1756_v28 }
  0x38   : > { %1668 = vmatprep.mubr.bf16.mxu0 %v1757_v29 }
  0x3e   : > { %1621 = vmatmul.mubr.bf16.gmra.mrb[12].mxu1 %v1758_v30 }
  0x3f   : > { %1669 = vmatmul.mubr.bf16.gmra.mrb[12].mxu0 %v1759_v31  ;;  %1624 = vmatprep.mubr.bf16.mxu1 %v1760_v32 }
  0x40   : > { %1672 = vmatprep.mubr.bf16.mxu0 %v1761_v33 }
  0x46   : > { %1625 = vmatmul.mubr.bf16.gmra.mrb[16].mxu1 %v1762_v34 }
  0x47   : > { %1673 = vmatmul.mubr.bf16.gmra.mrb[16].mxu0 %v1763_v35  ;;  %1628 = vmatprep.mubr.bf16.mxu1 %v1764_v36 }
  0x48   : > { %1676 = vmatprep.mubr.bf16.mxu0 %v1765_v37 }
  0x4e   : > { %1629 = vmatmul.mubr.bf16.gmra.mrb[20].mxu1 %v1766_v38 }
  0x4f   : > { %1677 = vmatmul.mubr.bf16.gmra.mrb[20].mxu0 %v1767_v39  ;;  %1632 = vmatprep.mubr.bf16.mxu1 %v1768_v40 }
  0x50   : > { %1680 = vmatprep.mubr.bf16.mxu0 %v1769_v41 }
  0x56   : > { %1633 = vmatmul.mubr.bf16.gmra.mrb[24].mxu1 %v1770_v42 }
  0x57   : > { %1681 = vmatmul.mubr.bf16.gmra.mrb[24].mxu0 %v1771_v43  ;;  %1636 = vmatprep.mubr.bf16.mxu1 %v1772_v44 }
  0x58   : > { %1684 = vmatprep.mubr.bf16.mxu0 %v1773_v45 }
  0x5e   : > { %1637 = vmatmul.mubr.bf16.gmra.mrb[28].mxu1 %v1774_v46 }
  0x5f   : > { %1685 = vmatmul.mubr.bf16.gmra.mrb[28].mxu0 %v1775_v47 }
  0xf9   : > { %v1610_v48 = vpop.f32.mrb[0].mxu1 }
  0xfa   : > { %v1658_v49 = vpop.f32.mrb[0].mxu0  ;;  %v552_v51 = vpop.f32.mrb[1].mxu1 }
  0xfb   : > { %v866_v52 = vadd.f32 %v1658_v49, %v1610_v48  ;;  %v857_v53 = vpop.f32.mrb[1].mxu0  ;;  %v1611_v54 = vpop.f32.mrb[2].mxu1 }
  0xfc   : > { %v858_v56 = vadd.f32 %v857_v53, %v552_v51  ;;  %v1659_v57 = vpop.f32.mrb[2].mxu0  ;;  %v555_v58 = vpop.f32.mrb[3].mxu1 }
  0xfd   : > { %v993_v59 = vmul.f32 %v1924_v50, %v866_v52  ;;  %v869_v60 = vadd.f32 %v1659_v57, %v1611_v54  ;;  %v860_v61 = vpop.f32.mrb[3].mxu0 }
  0xfe   : > { %v991_v62 = vmul.f32 %v1924_v50, %v858_v56  ;;  %v861_v63 = vadd.f32 %v860_v61, %v555_v58 }
  0xff   : > { %v1032_v0 = vadd.f32 %v1929_v55, %v993_v59  ;;  %v994_v1 = vmul.f32 %v1924_v50, %v869_v60 }
 0x100   : > { %v1030_v2 = vadd.f32 %v1929_v55, %v991_v62  ;;  %v992_v3 = vmul.f32 %v1924_v50, %v861_v63 }
 0x101   : > { %v1033_v4 = vadd.f32 %v1929_v55, %v994_v1  ;;  %v1614_v5 = vpop.f32.mrb[4].mxu1  ;;  %v1064_v9 = vmax.f32 %v1032_v0, 0.0 }
 0x102   : > { %v1031_v6 = vadd.f32 %v1929_v55, %v992_v3  ;;  %v1662_v7 = vpop.f32.mrb[4].mxu0  ;;  %v568_v8 = vpop.f32.mrb[5].mxu1  ;;  %v1062_v14 = vmax.f32 %v1030_v2, 0.0 }
 0x103   : > { %v1065_v10 = vmax.f32 %v1033_v4, 0.0  ;;  %v882_v11 = vadd.f32 %v1662_v7, %v1614_v5  ;;  %v873_v12 = vpop.f32.mrb[5].mxu0  ;;  %v1615_v13 = vpop.f32.mrb[6].mxu1 }
 0x104   : > { %v1063_v15 = vmax.f32 %v1031_v6, 0.0  ;;  %v874_v16 = vadd.f32 %v873_v12, %v568_v8  ;;  %v1663_v17 = vpop.f32.mrb[6].mxu0  ;;  %v571_v18 = vpop.f32.mrb[7].mxu1 }
 0x105   : > { %v1457_v19 = vpack.c.bf16 %v1065_v10, %v1064_v9  ;;  %v997_v20 = vmul.f32 %v1924_v50, %v882_v11  ;;  %v885_v21 = vadd.f32 %v1663_v17, %v1615_v13  ;;  %v876_v22 = vpop.f32.mrb[7].mxu0 }
 0x106   : > { %v1452_v23 = vpack.c.bf16 %v1063_v15, %v1062_v14  ;;  %v995_v24 = vmul.f32 %v1924_v50, %v874_v16  ;;  %v877_v25 = vadd.f32 %v876_v22, %v571_v18 }
 0x107   : > { %1529 = vst [vmem:[%s1943_s24 + $0x8] sm:$0xff] %v1457_v19   ;;  %v1036_v26 = vadd.f32 %v1929_v55, %v997_v20  ;;  %v998_v27 = vmul.f32 %v1924_v50, %v885_v21 }
 0x108   : > { %1453 = vst [vmem:[%s1943_s24] sm:$0xff] %v1452_v23   ;;  %v1034_v28 = vadd.f32 %v1929_v55, %v995_v24  ;;  %v996_v29 = vmul.f32 %v1924_v50, %v877_v25 }
 0x109   : > { %v1037_v30 = vadd.f32 %v1929_v55, %v998_v27  ;;  %v1618_v31 = vpop.f32.mrb[8].mxu1  ;;  %v1068_v35 = vmax.f32 %v1036_v26, 0.0 }
 0x10a   : > { %v1035_v32 = vadd.f32 %v1929_v55, %v996_v29  ;;  %v1666_v33 = vpop.f32.mrb[8].mxu0  ;;  %v584_v34 = vpop.f32.mrb[9].mxu1  ;;  %v1066_v40 = vmax.f32 %v1034_v28, 0.0 }
 0x10b   : > { %v1069_v36 = vmax.f32 %v1037_v30, 0.0  ;;  %v898_v37 = vadd.f32 %v1666_v33, %v1618_v31  ;;  %v889_v38 = vpop.f32.mrb[9].mxu0  ;;  %v1619_v39 = vpop.f32.mrb[10].mxu1 }
 0x10c   : > { %v1067_v41 = vmax.f32 %v1035_v32, 0.0  ;;  %v890_v42 = vadd.f32 %v889_v38, %v584_v34  ;;  %v1667_v43 = vpop.f32.mrb[10].mxu0  ;;  %v587_v44 = vpop.f32.mrb[11].mxu1 }
 0x10d   : > { %v1467_v45 = vpack.c.bf16 %v1069_v36, %v1068_v35  ;;  %v1001_v46 = vmul.f32 %v1924_v50, %v898_v37  ;;  %v901_v47 = vadd.f32 %v1667_v43, %v1619_v39  ;;  %v892_v48 = vpop.f32.mrb[11].mxu0 }
 0x10e   : > { %v1462_v49 = vpack.c.bf16 %v1067_v41, %v1066_v40  ;;  %v999_v51 = vmul.f32 %v1924_v50, %v890_v42  ;;  %v893_v52 = vadd.f32 %v892_v48, %v587_v44 }
 0x10f   : > { %1531 = vst [vmem:[%s1943_s24 + $0x18] sm:$0xff] %v1467_v45   ;;  %v1040_v53 = vadd.f32 %v1929_v55, %v1001_v46  ;;  %v1002_v54 = vmul.f32 %v1924_v50, %v901_v47 }
 0x110   : > { %1530 = vst [vmem:[%s1943_s24 + $0x10] sm:$0xff] %v1462_v49   ;;  %v1038_v56 = vadd.f32 %v1929_v55, %v999_v51  ;;  %v1000_v57 = vmul.f32 %v1924_v50, %v893_v52 }
 0x111   : > { %v1041_v58 = vadd.f32 %v1929_v55, %v1002_v54  ;;  %v1622_v59 = vpop.f32.mrb[12].mxu1  ;;  %v1072_v63 = vmax.f32 %v1040_v53, 0.0 }
 0x112   : > { %v1039_v60 = vadd.f32 %v1929_v55, %v1000_v57  ;;  %v1670_v61 = vpop.f32.mrb[12].mxu0  ;;  %v600_v62 = vpop.f32.mrb[13].mxu1  ;;  %v1070_v4 = vmax.f32 %v1038_v56, 0.0 }
 0x113   : > { %v1073_v0 = vmax.f32 %v1041_v58, 0.0  ;;  %v914_v1 = vadd.f32 %v1670_v61, %v1622_v59  ;;  %v905_v2 = vpop.f32.mrb[13].mxu0  ;;  %v1623_v3 = vpop.f32.mrb[14].mxu1 }
 0x114   : > { %v1071_v5 = vmax.f32 %v1039_v60, 0.0  ;;  %v906_v6 = vadd.f32 %v905_v2, %v600_v62  ;;  %v1671_v7 = vpop.f32.mrb[14].mxu0  ;;  %v603_v8 = vpop.f32.mrb[15].mxu1 }
 0x115   : > { %v1477_v9 = vpack.c.bf16 %v1073_v0, %v1072_v63  ;;  %v1005_v10 = vmul.f32 %v1924_v50, %v914_v1  ;;  %v917_v11 = vadd.f32 %v1671_v7, %v1623_v3  ;;  %v908_v12 = vpop.f32.mrb[15].mxu0 }
 0x116   : > { %v1472_v13 = vpack.c.bf16 %v1071_v5, %v1070_v4  ;;  %v1003_v14 = vmul.f32 %v1924_v50, %v906_v6  ;;  %v909_v15 = vadd.f32 %v908_v12, %v603_v8 }
 0x117   : > { %1533 = vst [vmem:[%s1943_s24 + $0x28] sm:$0xff] %v1477_v9   ;;  %v1044_v16 = vadd.f32 %v1929_v55, %v1005_v10  ;;  %v1006_v17 = vmul.f32 %v1924_v50, %v917_v11 }
 0x118   : > { %1532 = vst [vmem:[%s1943_s24 + $0x20] sm:$0xff] %v1472_v13   ;;  %v1042_v18 = vadd.f32 %v1929_v55, %v1003_v14  ;;  %v1004_v19 = vmul.f32 %v1924_v50, %v909_v15 }
 0x119   : > { %v1045_v20 = vadd.f32 %v1929_v55, %v1006_v17  ;;  %v1626_v21 = vpop.f32.mrb[16].mxu1  ;;  %v1076_v25 = vmax.f32 %v1044_v16, 0.0 }
 0x11a   : > { %v1043_v22 = vadd.f32 %v1929_v55, %v1004_v19  ;;  %v1674_v23 = vpop.f32.mrb[16].mxu0  ;;  %v616_v24 = vpop.f32.mrb[17].mxu1  ;;  %v1074_v30 = vmax.f32 %v1042_v18, 0.0 }
 0x11b   : > { %v1077_v26 = vmax.f32 %v1045_v20, 0.0  ;;  %v930_v27 = vadd.f32 %v1674_v23, %v1626_v21  ;;  %v921_v28 = vpop.f32.mrb[17].mxu0  ;;  %v1627_v29 = vpop.f32.mrb[18].mxu1 }
 0x11c   : > { %v1075_v31 = vmax.f32 %v1043_v22, 0.0  ;;  %v922_v32 = vadd.f32 %v921_v28, %v616_v24  ;;  %v1675_v33 = vpop.f32.mrb[18].mxu0  ;;  %v619_v34 = vpop.f32.mrb[19].mxu1 }
 0x11d   : > { %v1487_v35 = vpack.c.bf16 %v1077_v26, %v1076_v25  ;;  %v1009_v36 = vmul.f32 %v1924_v50, %v930_v27  ;;  %v933_v37 = vadd.f32 %v1675_v33, %v1627_v29  ;;  %v924_v38 = vpop.f32.mrb[19].mxu0 }
 0x11e   : > { %v1482_v39 = vpack.c.bf16 %v1075_v31, %v1074_v30  ;;  %v1007_v40 = vmul.f32 %v1924_v50, %v922_v32  ;;  %v925_v41 = vadd.f32 %v924_v38, %v619_v34 }
 0x11f   : > { %1535 = vst [vmem:[%s1943_s24 + $0x38] sm:$0xff] %v1487_v35   ;;  %v1048_v42 = vadd.f32 %v1929_v55, %v1009_v36  ;;  %v1010_v43 = vmul.f32 %v1924_v50, %v933_v37 }
 0x120   : > { %1534 = vst [vmem:[%s1943_s24 + $0x30] sm:$0xff] %v1482_v39   ;;  %v1046_v44 = vadd.f32 %v1929_v55, %v1007_v40  ;;  %v1008_v45 = vmul.f32 %v1924_v50, %v925_v41 }
 0x121   : > { %v1049_v46 = vadd.f32 %v1929_v55, %v1010_v43  ;;  %v1630_v47 = vpop.f32.mrb[20].mxu1  ;;  %v1080_v52 = vmax.f32 %v1048_v42, 0.0 }
 0x122   : > { %v1047_v48 = vadd.f32 %v1929_v55, %v1008_v45  ;;  %v1678_v49 = vpop.f32.mrb[20].mxu0  ;;  %v632_v51 = vpop.f32.mrb[21].mxu1  ;;  %v1078_v58 = vmax.f32 %v1046_v44, 0.0 }
 0x123   : > { %v1081_v53 = vmax.f32 %v1049_v46, 0.0  ;;  %v946_v54 = vadd.f32 %v1678_v49, %v1630_v47  ;;  %v937_v56 = vpop.f32.mrb[21].mxu0  ;;  %v1631_v57 = vpop.f32.mrb[22].mxu1 }
 0x124   : > { %v1079_v59 = vmax.f32 %v1047_v48, 0.0  ;;  %v938_v60 = vadd.f32 %v937_v56, %v632_v51  ;;  %v1679_v61 = vpop.f32.mrb[22].mxu0  ;;  %v635_v62 = vpop.f32.mrb[23].mxu1 }
 0x125   : > { %v1497_v63 = vpack.c.bf16 %v1081_v53, %v1080_v52  ;;  %v1013_v0 = vmul.f32 %v1924_v50, %v946_v54  ;;  %v949_v1 = vadd.f32 %v1679_v61, %v1631_v57  ;;  %v940_v2 = vpop.f32.mrb[23].mxu0 }
 0x126   : > { %v1492_v3 = vpack.c.bf16 %v1079_v59, %v1078_v58  ;;  %v1011_v4 = vmul.f32 %v1924_v50, %v938_v60  ;;  %v941_v5 = vadd.f32 %v940_v2, %v635_v62 }
 0x127   : > { %1537 = vst [vmem:[%s1943_s24 + $0x48] sm:$0xff] %v1497_v63   ;;  %v1052_v6 = vadd.f32 %v1929_v55, %v1013_v0  ;;  %v1014_v7 = vmul.f32 %v1924_v50, %v949_v1 }
 0x128   : > { %1536 = vst [vmem:[%s1943_s24 + $0x40] sm:$0xff] %v1492_v3   ;;  %v1050_v8 = vadd.f32 %v1929_v55, %v1011_v4  ;;  %v1012_v9 = vmul.f32 %v1924_v50, %v941_v5 }
 0x129   : > { %v1053_v10 = vadd.f32 %v1929_v55, %v1014_v7  ;;  %v1634_v11 = vpop.f32.mrb[24].mxu1  ;;  %v1084_v15 = vmax.f32 %v1052_v6, 0.0 }
 0x12a   : > { %v1051_v12 = vadd.f32 %v1929_v55, %v1012_v9  ;;  %v1682_v13 = vpop.f32.mrb[24].mxu0  ;;  %v648_v14 = vpop.f32.mrb[25].mxu1  ;;  %v1082_v20 = vmax.f32 %v1050_v8, 0.0 }
 0x12b   : > { %v1085_v16 = vmax.f32 %v1053_v10, 0.0  ;;  %v962_v17 = vadd.f32 %v1682_v13, %v1634_v11  ;;  %v953_v18 = vpop.f32.mrb[25].mxu0  ;;  %v1635_v19 = vpop.f32.mrb[26].mxu1 }
 0x12c   : > { %v1083_v21 = vmax.f32 %v1051_v12, 0.0  ;;  %v954_v22 = vadd.f32 %v953_v18, %v648_v14  ;;  %v1683_v23 = vpop.f32.mrb[26].mxu0  ;;  %v651_v24 = vpop.f32.mrb[27].mxu1 }
 0x12d   : > { %v1507_v25 = vpack.c.bf16 %v1085_v16, %v1084_v15  ;;  %v1017_v26 = vmul.f32 %v1924_v50, %v962_v17  ;;  %v965_v27 = vadd.f32 %v1683_v23, %v1635_v19  ;;  %v956_v28 = vpop.f32.mrb[27].mxu0 }
 0x12e   : > { %v1502_v29 = vpack.c.bf16 %v1083_v21, %v1082_v20  ;;  %v1015_v30 = vmul.f32 %v1924_v50, %v954_v22  ;;  %v957_v31 = vadd.f32 %v956_v28, %v651_v24 }
 0x12f   : > { %1539 = vst [vmem:[%s1943_s24 + $0x58] sm:$0xff] %v1507_v25   ;;  %v1056_v32 = vadd.f32 %v1929_v55, %v1017_v26  ;;  %v1018_v33 = vmul.f32 %v1924_v50, %v965_v27 }
 0x130   : > { %1538 = vst [vmem:[%s1943_s24 + $0x50] sm:$0xff] %v1502_v29   ;;  %v1054_v34 = vadd.f32 %v1929_v55, %v1015_v30  ;;  %v1016_v35 = vmul.f32 %v1924_v50, %v957_v31 }
 0x131   : > { %v1057_v36 = vadd.f32 %v1929_v55, %v1018_v33  ;;  %v1638_v37 = vpop.f32.mrb[28].mxu1  ;;  %v1088_v41 = vmax.f32 %v1056_v32, 0.0 }
 0x132   : > { %v1055_v38 = vadd.f32 %v1929_v55, %v1016_v35  ;;  %v1686_v39 = vpop.f32.mrb[28].mxu0  ;;  %v664_v40 = vpop.f32.mrb[29].mxu1  ;;  %v1086_v46 = vmax.f32 %v1054_v34, 0.0 }
 0x133   : > { %v1089_v42 = vmax.f32 %v1057_v36, 0.0  ;;  %v978_v43 = vadd.f32 %v1686_v39, %v1638_v37  ;;  %v969_v44 = vpop.f32.mrb[29].mxu0  ;;  %v1639_v45 = vpop.f32.mrb[30].mxu1 }
 0x134   : > { %v1087_v47 = vmax.f32 %v1055_v38, 0.0  ;;  %v970_v48 = vadd.f32 %v969_v44, %v664_v40  ;;  %v1687_v49 = vpop.f32.mrb[30].mxu0  ;;  %v667_v51 = vpop.f32.mrb[31].mxu1 }
 0x135   : > { %v1517_v52 = vpack.c.bf16 %v1089_v42, %v1088_v41  ;;  %v1021_v53 = vmul.f32 %v1924_v50, %v978_v43  ;;  %v981_v54 = vadd.f32 %v1687_v49, %v1639_v45  ;;  %v972_v56 = vpop.f32.mrb[31].mxu0 }
 0x136   : > { %v1512_v57 = vpack.c.bf16 %v1087_v47, %v1086_v46  ;;  %v1019_v58 = vmul.f32 %v1924_v50, %v970_v48  ;;  %v973_v59 = vadd.f32 %v972_v56, %v667_v51 }
 0x137   : > { %1541 = vst [vmem:[%s1943_s24 + $0x68] sm:$0xff] %v1517_v52   ;;  %v1060_v60 = vadd.f32 %v1929_v55, %v1021_v53  ;;  %v1022_v61 = vmul.f32 %v1924_v50, %v981_v54 }
 0x138   : > { %1540 = vst [vmem:[%s1943_s24 + $0x60] sm:$0xff] %v1512_v57   ;;  %v1058_v62 = vadd.f32 %v1929_v55, %v1019_v58  ;;  %v1020_v63 = vmul.f32 %v1924_v50, %v973_v59 }
 0x139   : > { %v1061_v0 = vadd.f32 %v1929_v55, %v1022_v61  ;;  %v1092_v2 = vmax.f32 %v1060_v60, 0.0 }
 0x13a   : > { %v1059_v1 = vadd.f32 %v1929_v55, %v1020_v63  ;;  %v1090_v4 = vmax.f32 %v1058_v62, 0.0 }
 0x13b   : > { %v1093_v3 = vmax.f32 %v1061_v0, 0.0 }
 0x13c   : > { %v1091_v5 = vmax.f32 %v1059_v1, 0.0 }
 0x13d   : > { %v1527_v6 = vpack.c.bf16 %v1093_v3, %v1092_v2 }
 0x13e   : > { %v1522_v7 = vpack.c.bf16 %v1091_v5, %v1090_v4 }
 0x13f   : > { %1543 = vst [vmem:[%s1943_s24 + $0x78] sm:$0xff] %v1527_v6  }
 0x140   : > { %1542 = vst [vmem:[%s1943_s24 + $0x70] sm:$0xff] %v1522_v7  }
 0x141 PF: > { %s16_s21 = sadd.s32 1, %s1782_s21  }
 0x142   : > { %p13_p4 = scmp.ge.s32.totalorder %s16_s21, 4  }
 0x144   :  { %15 = sbr.rel (!%p13_p4) target bundleno = 1 (0x1), region = 77 }

// kernel: _lambda_.4
= control target key start
LH: loop header
LB: loop body
LE: loop exit
PB: predicated region body
PF: predicated region fallthrough
CT: control target
= control target key end

     0   :  { %s1470_s15 = smov 0   ;;  %s1472_s16 = smov 0   ;;  %s1644_s0 = inlined_call_operand.vmem [shape: bf16[512,128], index: 0, kind: input, shape index: {}]   ;;  %s1645_s1 = inlined_call_operand.vmem [shape: bf16[128,128], index: 1, kind: input, shape index: {}]   ;;  %s1646_s2 = inlined_call_operand.vmem [shape: f32[1,128], index: 2, kind: input, shape index: {}]   ;;  %s1647_s3 = inlined_call_operand.vmem [shape: f32[1,128], index: 3, kind: input, shape index: {}]   ;;  %s1648_s4 = inlined_call_operand.vmem [shape: bf16[512,128], index: 4, kind: output, shape index: {}]  }
   0x1   :  { %s1474_s17 = smov 0  }
   0x2 LB: > { %s26_s18 = sadd.s32 1, %s1439_s16  ;;  %p1093_p0 = scmp.ge.s32.totalorder %s1443_s17, 1  ;;  %s1443_s17 = sphi %s1474_s17, %s14_s17   ;;  %s1439_s16 = sphi %s1472_s16, %s1650_s16   ;;  %s1435_s15 = sphi %s1470_s15, %s1649_s15  }
   0x3   : > { %p28_p1 = scmp.ge.s32.totalorder %s26_s18, 2  ;;  %p191_p2 = scmp.lt.s32.totalorder %s1443_s17, 3 }
   0x5   : > { %s1652_s18 = smov (%p28_p1, %s26_s18), 0  ;;  %p192_p3 = pnand %p1093_p0, %p191_p2 }
   0x6   : > { %v1397_v0 = vld [vmem:[%s1645_s1] sm:$0xff] (!%p192_p3)   ;;  %s1094_s21 = sshll.u32 (!%p192_p3), %s1435_s15, 5  ;;  %v1398_v1 = vld [vmem:[%s1645_s1 + $0x8] sm:$0xff] (!%p192_p3)   ;;  %v1399_v2 = vld [vmem:[%s1645_s1 + $0x10] sm:$0xff] (!%p192_p3)  }
   0x7   : > { %195 = sbr.rel (%p192_p3) target bundleno = 285 (0x11d), region = 36  ;;  %p226_p4 = scmp.lt.s32.totalorder (!%p192_p3), %s1094_s21, 63  ;;  %1309 = vmatprep.subr.bf16.mxu0 (!%p192_p3), %v1397_v0  ;;  %1357 = vmatprep.subr.bf16.mxu1 (!%p192_p3), %v1397_v0  ;;  %v1400_v3 = vld [vmem:[%s1645_s1 + $0x18] sm:$0xff] (!%p192_p3)   ;;  %v1401_v6 = vld [vmem:[%s1645_s1 + $0x20] sm:$0xff] (!%p192_p3)   ;;  %v1402_v7 = vld [vmem:[%s1645_s1 + $0x28] sm:$0xff] (!%p192_p3)  }
   0x8   : > { %1310 = vmatpush3.bf16.msra.mxu0 (!%p192_p3), %v1397_v0  ;;  %1365 = vmatpush3.bf16.msra.mxu1 (!%p192_p3), %v1397_v0  ;;  %v1403_v8 = vld [vmem:[%s1645_s1 + $0x30] sm:$0xff] (!%p192_p3)   ;;  %v1404_v9 = vld [vmem:[%s1645_s1 + $0x38] sm:$0xff] (!%p192_p3)   ;;  %v1541_v24 = vld [vmem:[%s1646_s2] ss:$0 sm:$0xff] (!%p192_p3) }
   0x9   : > { %1311 = vmatprep.subr.bf16.mxu0 (!%p192_p3), %v1398_v1  ;;  %1358 = vmatprep.subr.bf16.mxu1 (!%p192_p3), %v1398_v1  ;;  %v1548_v31 = vld [vmem:[%s1647_s3] ss:$0 sm:$0xff] (!%p192_p3) }
   0xc   : > { %1312 = vmatpush3.bf16.msra.mxu0 (!%p192_p3), %v1398_v1  ;;  %1366 = vmatpush3.bf16.msra.mxu1 (!%p192_p3), %v1398_v1 }
   0xd   : > { %1313 = vmatprep.subr.bf16.mxu0 (!%p192_p3), %v1399_v2  ;;  %1359 = vmatprep.subr.bf16.mxu1 (!%p192_p3), %v1399_v2 }
   0xe   : > { %s1654_s21 = smov (!%p226_p4, %s1094_s21), 63 }
   0xf   : > { %s1095_s26 = sshll.u32 %s1654_s21, 2 }
  0x10   : > { %s1505_s29 = scalar_lea.vmem %s1644_s0, %s1095_s26  ;;  %1314 = vmatpush3.bf16.msra.mxu0 %v1399_v2  ;;  %1367 = vmatpush3.bf16.msra.mxu1 %v1399_v2  ;;  %s1567_s24 = scalar_lea.vmem %s1648_s4, %s1095_s26 }
  0x11   : > { %v1405_v4 = vld [vmem:[%s1505_s29] sm:$0xff]   ;;  %1315 = vmatprep.subr.bf16.mxu0 %v1400_v3  ;;  %1360 = vmatprep.subr.bf16.mxu1 %v1400_v3  ;;  %v1407_v10 = vld [vmem:[%s1505_s29 + $0x8] sm:$0xff]   ;;  %v1409_v12 = vld [vmem:[%s1505_s29 + $0x10] sm:$0xff]  }
  0x12   : > { %v1406_v5 = vld [vmem:[%s1505_s29 + $0x40] sm:$0xff]   ;;  %1325 = vmatprep.mubr.bf16.mxu0 %v1405_v4  ;;  %v1408_v11 = vld [vmem:[%s1505_s29 + $0x48] sm:$0xff]   ;;  %v1410_v13 = vld [vmem:[%s1505_s29 + $0x50] sm:$0xff]  }
  0x13   : > { %1341 = vmatprep.mubr.bf16.mxu1 %v1406_v5  ;;  %v1411_v14 = vld [vmem:[%s1505_s29 + $0x18] sm:$0xff]   ;;  %v1413_v16 = vld [vmem:[%s1505_s29 + $0x20] sm:$0xff]   ;;  %v1415_v18 = vld [vmem:[%s1505_s29 + $0x28] sm:$0xff]  }
  0x14   : > { %1316 = vmatpush3.bf16.msra.mxu0 %v1400_v3  ;;  %1368 = vmatpush3.bf16.msra.mxu1 %v1400_v3  ;;  %v1412_v15 = vld [vmem:[%s1505_s29 + $0x58] sm:$0xff]   ;;  %v1414_v17 = vld [vmem:[%s1505_s29 + $0x60] sm:$0xff]   ;;  %v1416_v19 = vld [vmem:[%s1505_s29 + $0x68] sm:$0xff]  }
  0x15   : > { %1317 = vmatprep.subr.bf16.mxu0 %v1401_v6  ;;  %1361 = vmatprep.subr.bf16.mxu1 %v1401_v6  ;;  %v1417_v20 = vld [vmem:[%s1505_s29 + $0x30] sm:$0xff]   ;;  %v1419_v22 = vld [vmem:[%s1505_s29 + $0x38] sm:$0xff]  }
  0x16   : > { %v1418_v21 = vld [vmem:[%s1505_s29 + $0x70] sm:$0xff]   ;;  %v1420_v23 = vld [vmem:[%s1505_s29 + $0x78] sm:$0xff]  }
  0x18   : > { %1318 = vmatpush3.bf16.msra.mxu0 %v1401_v6  ;;  %1369 = vmatpush3.bf16.msra.mxu1 %v1401_v6 }
  0x19   : > { %1319 = vmatprep.subr.bf16.mxu0 %v1402_v7  ;;  %1362 = vmatprep.subr.bf16.mxu1 %v1402_v7 }
  0x1c   : > { %1320 = vmatpush3.bf16.msra.mxu0 %v1402_v7  ;;  %1370 = vmatpush3.bf16.msra.mxu1 %v1402_v7 }
  0x1d   : > { %1321 = vmatprep.subr.bf16.mxu0 %v1403_v8  ;;  %1363 = vmatprep.subr.bf16.mxu1 %v1403_v8 }
  0x20   : > { %1322 = vmatpush3.bf16.msra.mxu0 %v1403_v8  ;;  %1371 = vmatpush3.bf16.msra.mxu1 %v1403_v8 }
  0x21   : > { %1323 = vmatprep.subr.bf16.mxu0 %v1404_v9  ;;  %1364 = vmatprep.subr.bf16.mxu1 %v1404_v9 }
  0x24   : > { %1324 = vmatpush3.bf16.msra.mxu0 %v1404_v9  ;;  %1372 = vmatpush3.bf16.msra.mxu1 %v1404_v9 }
  0x27   : > { %1326 = vmatmul.mubr.bf16.vlgmr.msra.gmra.mrb[0].mxu0 %v1407_v10  ;;  %1342 = vmatmul.mubr.bf16.vlgmr.msra.gmra.mrb[0].mxu1 %v1408_v11 }
  0x28   : > { %1329 = vmatprep.mubr.bf16.mxu0 %v1409_v12  ;;  %1345 = vmatprep.mubr.bf16.mxu1 %v1410_v13 }
  0x2f   : > { %1330 = vmatmul.mubr.bf16.gmra.mrb[4].mxu0 %v1411_v14  ;;  %1346 = vmatmul.mubr.bf16.gmra.mrb[4].mxu1 %v1412_v15 }
  0x30   : > { %1333 = vmatprep.mubr.bf16.mxu0 %v1413_v16  ;;  %1349 = vmatprep.mubr.bf16.mxu1 %v1414_v17 }
  0x37   : > { %1334 = vmatmul.mubr.bf16.gmra.mrb[8].mxu0 %v1415_v18  ;;  %1350 = vmatmul.mubr.bf16.gmra.mrb[8].mxu1 %v1416_v19 }
  0x38   : > { %1337 = vmatprep.mubr.bf16.mxu0 %v1417_v20  ;;  %1353 = vmatprep.mubr.bf16.mxu1 %v1418_v21 }
  0x3f   : > { %1338 = vmatmul.mubr.bf16.gmra.mrb[12].mxu0 %v1419_v22  ;;  %1354 = vmatmul.mubr.bf16.gmra.mrb[12].mxu1 %v1420_v23 }
  0xfa   : > { %v1327_v25 = vpop.f32.mrb[0].mxu0  ;;  %v1343_v26 = vpop.f32.mrb[0].mxu1 }
  0xfb   : > { %v776_v27 = vmul.f32 %v1327_v25, %v1541_v24  ;;  %v792_v28 = vmul.f32 %v1343_v26, %v1541_v24  ;;  %v541_v29 = vpop.f32.mrb[1].mxu0  ;;  %v605_v30 = vpop.f32.mrb[1].mxu1 }
  0xfc   : > { %v774_v32 = vmul.f32 %v1541_v24, %v541_v29  ;;  %v790_v33 = vmul.f32 %v1541_v24, %v605_v30  ;;  %v1328_v34 = vpop.f32.mrb[2].mxu0  ;;  %v1344_v35 = vpop.f32.mrb[2].mxu1 }
  0xfd   : > { %v777_v36 = vmul.f32 %v1328_v34, %v1541_v24  ;;  %v793_v37 = vmul.f32 %v1344_v35, %v1541_v24  ;;  %v544_v38 = vpop.f32.mrb[3].mxu0  ;;  %v608_v39 = vpop.f32.mrb[3].mxu1  ;;  %v815_v42 = vadd.f32 %v1548_v31, %v776_v27  ;;  %v831_v43 = vadd.f32 %v1548_v31, %v792_v28 }
  0xfe   : > { %v775_v40 = vmul.f32 %v1541_v24, %v544_v38  ;;  %v791_v41 = vmul.f32 %v1541_v24, %v608_v39  ;;  %v813_v46 = vadd.f32 %v1548_v31, %v774_v32  ;;  %v829_v47 = vadd.f32 %v1548_v31, %v790_v33 }
  0xff   : > { %v816_v44 = vadd.f32 %v1548_v31, %v777_v36  ;;  %v832_v45 = vadd.f32 %v1548_v31, %v793_v37 }
 0x100   : > { %v814_v48 = vadd.f32 %v1548_v31, %v775_v40  ;;  %v830_v49 = vadd.f32 %v1548_v31, %v791_v41 }
 0x101   : > { %v1198_v50 = vpack.c.bf16 %v816_v44, %v815_v42  ;;  %v1238_v51 = vpack.c.bf16 %v832_v45, %v831_v43 }
 0x102   : > { %v1193_v52 = vpack.c.bf16 %v814_v48, %v813_v46  ;;  %v1233_v53 = vpack.c.bf16 %v830_v49, %v829_v47  ;;  %v1331_v54 = vpop.f32.mrb[4].mxu0  ;;  %v1347_v55 = vpop.f32.mrb[4].mxu1 }
 0x103   : > { %1270 = vst [vmem:[%s1567_s24 + $0x8] sm:$0xff] %v1198_v50   ;;  %1278 = vst [vmem:[%s1567_s24 + $0x48] sm:$0xff] %v1238_v51   ;;  %v780_v56 = vmul.f32 %v1331_v54, %v1541_v24  ;;  %v796_v57 = vmul.f32 %v1347_v55, %v1541_v24  ;;  %v557_v58 = vpop.f32.mrb[5].mxu0  ;;  %v621_v59 = vpop.f32.mrb[5].mxu1 }
 0x104   : > { %1194 = vst [vmem:[%s1567_s24] sm:$0xff] %v1193_v52   ;;  %1277 = vst [vmem:[%s1567_s24 + $0x40] sm:$0xff] %v1233_v53   ;;  %v778_v60 = vmul.f32 %v1541_v24, %v557_v58  ;;  %v794_v61 = vmul.f32 %v1541_v24, %v621_v59  ;;  %v1332_v62 = vpop.f32.mrb[6].mxu0  ;;  %v1348_v63 = vpop.f32.mrb[6].mxu1 }
 0x105   : > { %v781_v0 = vmul.f32 %v1332_v62, %v1541_v24  ;;  %v797_v1 = vmul.f32 %v1348_v63, %v1541_v24  ;;  %v560_v2 = vpop.f32.mrb[7].mxu0  ;;  %v624_v3 = vpop.f32.mrb[7].mxu1  ;;  %v819_v6 = vadd.f32 %v1548_v31, %v780_v56  ;;  %v835_v7 = vadd.f32 %v1548_v31, %v796_v57 }
 0x106   : > { %v779_v4 = vmul.f32 %v1541_v24, %v560_v2  ;;  %v795_v5 = vmul.f32 %v1541_v24, %v624_v3  ;;  %v817_v10 = vadd.f32 %v1548_v31, %v778_v60  ;;  %v833_v11 = vadd.f32 %v1548_v31, %v794_v61 }
 0x107   : > { %v820_v8 = vadd.f32 %v1548_v31, %v781_v0  ;;  %v836_v9 = vadd.f32 %v1548_v31, %v797_v1 }
 0x108   : > { %v818_v12 = vadd.f32 %v1548_v31, %v779_v4  ;;  %v834_v13 = vadd.f32 %v1548_v31, %v795_v5 }
 0x109   : > { %v1208_v14 = vpack.c.bf16 %v820_v8, %v819_v6  ;;  %v1248_v15 = vpack.c.bf16 %v836_v9, %v835_v7 }
 0x10a   : > { %v1203_v16 = vpack.c.bf16 %v818_v12, %v817_v10  ;;  %v1243_v17 = vpack.c.bf16 %v834_v13, %v833_v11  ;;  %v1335_v18 = vpop.f32.mrb[8].mxu0  ;;  %v1351_v19 = vpop.f32.mrb[8].mxu1 }
 0x10b   : > { %1272 = vst [vmem:[%s1567_s24 + $0x18] sm:$0xff] %v1208_v14   ;;  %1280 = vst [vmem:[%s1567_s24 + $0x58] sm:$0xff] %v1248_v15   ;;  %v784_v20 = vmul.f32 %v1335_v18, %v1541_v24  ;;  %v800_v21 = vmul.f32 %v1351_v19, %v1541_v24  ;;  %v573_v22 = vpop.f32.mrb[9].mxu0  ;;  %v637_v23 = vpop.f32.mrb[9].mxu1 }
 0x10c   : > { %1271 = vst [vmem:[%s1567_s24 + $0x10] sm:$0xff] %v1203_v16   ;;  %1279 = vst [vmem:[%s1567_s24 + $0x50] sm:$0xff] %v1243_v17   ;;  %v782_v25 = vmul.f32 %v1541_v24, %v573_v22  ;;  %v798_v26 = vmul.f32 %v1541_v24, %v637_v23  ;;  %v1336_v27 = vpop.f32.mrb[10].mxu0  ;;  %v1352_v28 = vpop.f32.mrb[10].mxu1 }
 0x10d   : > { %v785_v29 = vmul.f32 %v1336_v27, %v1541_v24  ;;  %v801_v30 = vmul.f32 %v1352_v28, %v1541_v24  ;;  %v576_v32 = vpop.f32.mrb[11].mxu0  ;;  %v640_v33 = vpop.f32.mrb[11].mxu1  ;;  %v823_v36 = vadd.f32 %v1548_v31, %v784_v20  ;;  %v839_v37 = vadd.f32 %v1548_v31, %v800_v21 }
 0x10e   : > { %v783_v34 = vmul.f32 %v1541_v24, %v576_v32  ;;  %v799_v35 = vmul.f32 %v1541_v24, %v640_v33  ;;  %v821_v40 = vadd.f32 %v1548_v31, %v782_v25  ;;  %v837_v41 = vadd.f32 %v1548_v31, %v798_v26 }
 0x10f   : > { %v824_v38 = vadd.f32 %v1548_v31, %v785_v29  ;;  %v840_v39 = vadd.f32 %v1548_v31, %v801_v30 }
 0x110   : > { %v822_v42 = vadd.f32 %v1548_v31, %v783_v34  ;;  %v838_v43 = vadd.f32 %v1548_v31, %v799_v35 }
 0x111   : > { %v1218_v44 = vpack.c.bf16 %v824_v38, %v823_v36  ;;  %v1258_v45 = vpack.c.bf16 %v840_v39, %v839_v37 }
 0x112   : > { %v1213_v46 = vpack.c.bf16 %v822_v42, %v821_v40  ;;  %v1253_v47 = vpack.c.bf16 %v838_v43, %v837_v41  ;;  %v1339_v48 = vpop.f32.mrb[12].mxu0  ;;  %v1355_v49 = vpop.f32.mrb[12].mxu1 }
 0x113   : > { %1274 = vst [vmem:[%s1567_s24 + $0x28] sm:$0xff] %v1218_v44   ;;  %1282 = vst [vmem:[%s1567_s24 + $0x68] sm:$0xff] %v1258_v45   ;;  %v788_v50 = vmul.f32 %v1339_v48, %v1541_v24  ;;  %v804_v51 = vmul.f32 %v1355_v49, %v1541_v24  ;;  %v589_v52 = vpop.f32.mrb[13].mxu0  ;;  %v653_v53 = vpop.f32.mrb[13].mxu1 }
 0x114   : > { %1273 = vst [vmem:[%s1567_s24 + $0x20] sm:$0xff] %v1213_v46   ;;  %1281 = vst [vmem:[%s1567_s24 + $0x60] sm:$0xff] %v1253_v47   ;;  %v786_v54 = vmul.f32 %v1541_v24, %v589_v52  ;;  %v802_v55 = vmul.f32 %v1541_v24, %v653_v53  ;;  %v1340_v56 = vpop.f32.mrb[14].mxu0  ;;  %v1356_v57 = vpop.f32.mrb[14].mxu1 }
 0x115   : > { %v789_v58 = vmul.f32 %v1340_v56, %v1541_v24  ;;  %v805_v59 = vmul.f32 %v1356_v57, %v1541_v24  ;;  %v592_v60 = vpop.f32.mrb[15].mxu0  ;;  %v656_v61 = vpop.f32.mrb[15].mxu1  ;;  %v827_v0 = vadd.f32 %v1548_v31, %v788_v50  ;;  %v843_v1 = vadd.f32 %v1548_v31, %v804_v51 }
 0x116   : > { %v787_v62 = vmul.f32 %v1541_v24, %v592_v60  ;;  %v803_v63 = vmul.f32 %v1541_v24, %v656_v61  ;;  %v825_v4 = vadd.f32 %v1548_v31, %v786_v54  ;;  %v841_v5 = vadd.f32 %v1548_v31, %v802_v55 }
 0x117   : > { %v828_v2 = vadd.f32 %v1548_v31, %v789_v58  ;;  %v844_v3 = vadd.f32 %v1548_v31, %v805_v59 }
 0x118   : > { %v826_v6 = vadd.f32 %v1548_v31, %v787_v62  ;;  %v842_v7 = vadd.f32 %v1548_v31, %v803_v63 }
 0x119   : > { %v1228_v8 = vpack.c.bf16 %v828_v2, %v827_v0  ;;  %v1268_v9 = vpack.c.bf16 %v844_v3, %v843_v1 }
 0x11a   : > { %v1223_v24 = vpack.c.bf16 %v826_v6, %v825_v4  ;;  %v1263_v10 = vpack.c.bf16 %v842_v7, %v841_v5 }
 0x11b   : > { %1276 = vst [vmem:[%s1567_s24 + $0x38] sm:$0xff] %v1228_v8   ;;  %1284 = vst [vmem:[%s1567_s24 + $0x78] sm:$0xff] %v1268_v9  }
 0x11c   : > { %1275 = vst [vmem:[%s1567_s24 + $0x30] sm:$0xff] %v1223_v24   ;;  %1283 = vst [vmem:[%s1567_s24 + $0x70] sm:$0xff] %v1263_v10  }
 0x11d PF: > { %s14_s17 = sadd.s32 1, %s1443_s17   ;;  %s1649_s15 = smov %s1439_s16 }
 0x11e   : > { %p11_p5 = scmp.ge.s32.totalorder %s14_s17, 4   ;;  %s1650_s16 = smov %s1652_s18 }
 0x120   :  { %13 = sbr.rel (!%p11_p5) target bundleno = 2 (0x2), region = 77 }

// kernel: _lambda_.6
= control target key start
LH: loop header
LB: loop body
LE: loop exit
PB: predicated region body
PF: predicated region fallthrough
CT: control target
= control target key end

     0   :  { %s1739_s15 = smov 0   ;;  %s1741_s16 = smov 0   ;;  %s2021_s0 = inlined_call_operand.vmem [shape: bf16[512,1152], index: 0, kind: input, shape index: {}]   ;;  %s2022_s1 = inlined_call_operand.vmem [shape: bf16[1152,128], index: 1, kind: input, shape index: {}]   ;;  %s2023_s2 = inlined_call_operand.vmem [shape: f32[1,128], index: 2, kind: input, shape index: {}]   ;;  %s2024_s3 = inlined_call_operand.vmem [shape: f32[1,128], index: 3, kind: input, shape index: {}]   ;;  %s2025_s4 = inlined_call_operand.vmem [shape: bf16[512,128], index: 4, kind: output, shape index: {}]  }
   0x1   :  { %s1743_s17 = smov 0   ;;  %s1745_s18 = smov 0  }
   0x2   :  { %s1747_s19 = smov 0   ;;  %s1749_s20 = smov 0  }
   0x3   :  { %s1751_s21 = smov 0  }
   0x4 LB: > { %s23_s22 = sadd.s32 1, %s1703_s19  ;;  %s26_s23 = sadd.s32 1, %s1707_s20  ;;  %s1711_s21 = sphi %s1751_s21, %s14_s21   ;;  %s1707_s20 = sphi %s1749_s20, %s2031_s20   ;;  %s1703_s19 = sphi %s1747_s19, %s2030_s19   ;;  %s1699_s18 = sphi %s1745_s18, %s2029_s18   ;;  %s1695_s17 = sphi %s1743_s17, %s2028_s17   ;;  %s1691_s16 = sphi %s1741_s16, %s2027_s16   ;;  %s1687_s15 = sphi %s1739_s15, %s2026_s15  }
   0x5   : > { %p24_p0 = scmp.ge.s32.totalorder %s23_s22, 9  ;;  %p42_p1 = scmp.ne.s32.totalorder %s1691_s16, %s1687_s15 }
   0x6   : > { %p43_p2 = scmp.eq.s32.totalorder %s1711_s21, 0  ;;  %s35_s27 = sadd.s32 1, %s1691_s16 }
   0x7   : > { %s2033_s22 = smov (%p24_p0, %s23_s22), 0  ;;  %s2035_s23 = smov (!%p24_p0, %s26_s23), %s1707_s20 }
   0x8   : > { %p44_p3 = por %p43_p2, %p42_p1  ;;  %p28_p4 = scmp.ge.s32.totalorder %s2035_s23, 2 }
   0x9   : > { %s31_s24 = ssub.s32 %s1703_s19, %s2033_s22  ;;  %p1287_p6 = scmp.ge.s32.totalorder %s1711_s21, 18 }
   0xa   : > { %s2037_s23 = smov (%p28_p4, %s2035_s23), 0 }
   0xb   : > { %s30_s25 = ssub.s32 %s1707_s20, %s2037_s23  ;;  %168 = sbr.rel (%p1287_p6) target bundleno = 46 (0x2e), region = 24 }
   0xc   : > { %s32_s26 = sor.u32 %s31_s24, %s30_s25 }
   0xd   : > { %p33_p5 = scmp.eq.s32.totalorder %s32_s26, 0 }
   0xf   : > { %s1790_s28 = scalar_select %p33_p5, %s1691_s16, %s35_s27  }
  0x12   : > { %171 = sbr.rel (!%p44_p3) target bundleno = 46 (0x2e), region = 28  ;;  %s173_s29 = sand.u32 (%p44_p3), 1, %s1691_s16  }
  0x13   : > { %s1575_s30 = smul.u32 (%p44_p3), 288, %s1707_s20  ;;  %s1288_s5 = sshll.u32 (%p44_p3), %s173_s29, 7 }
  0x14   : > { %s1804_s11 = scalar_lea.vmem (%p44_p3), [#allocation3], %s1288_s5 }
  0x15   : > { %s178_s6 = sadd.s32 (%p44_p3), %s1703_s19, %s1575_s30 }
  0x16   : > { %s1291_s7 = sshll.u32 (%p44_p3), %s178_s6, 2 }
  0x17   : > { %s1799_s10 = scalar_lea.vmem (%p44_p3), %s2021_s0, %s1291_s7 }
  0x18   : > { %v196_v0 = vld [vmem:[%s1799_s10] sm:$0xf] (%p44_p3)  ;;  %v198_v1 = vld [vmem:[%s1799_s10 + $0x24] sm:$0xf] (%p44_p3)  ;;  %v200_v2 = vld [vmem:[%s1799_s10 + $0x48] sm:$0xf] (%p44_p3) }
  0x19   : > { %197 = vst [vmem:[%s1804_s11] sm:$0xf] %v196_v0  ;;  %199 = vst [vmem:[%s1804_s11 + $0x4] sm:$0xf] %v198_v1  ;;  %v202_v3 = vld [vmem:[%s1799_s10 + $0x6c] sm:$0xf] }
  0x1a   : > { %201 = vst [vmem:[%s1804_s11 + $0x8] sm:$0xf] %v200_v2  ;;  %v204_v4 = vld [vmem:[%s1799_s10 + $0x90] sm:$0xf]  ;;  %v206_v5 = vld [vmem:[%s1799_s10 + $0xb4] sm:$0xf] }
  0x1b   : > { %203 = vst [vmem:[%s1804_s11 + $0xc] sm:$0xf] %v202_v3  ;;  %205 = vst [vmem:[%s1804_s11 + $0x10] sm:$0xf] %v204_v4  ;;  %v208_v6 = vld [vmem:[%s1799_s10 + $0xd8] sm:$0xf] }
  0x1c   : > { %207 = vst [vmem:[%s1804_s11 + $0x14] sm:$0xf] %v206_v5  ;;  %v210_v7 = vld [vmem:[%s1799_s10 + $0xfc] sm:$0xf]  ;;  %v212_v8 = vld [vmem:[%s1799_s10 + $0x120] sm:$0xf] }
  0x1d   : > { %209 = vst [vmem:[%s1804_s11 + $0x18] sm:$0xf] %v208_v6  ;;  %211 = vst [vmem:[%s1804_s11 + $0x1c] sm:$0xf] %v210_v7  ;;  %v214_v9 = vld [vmem:[%s1799_s10 + $0x144] sm:$0xf] }
  0x1e   : > { %213 = vst [vmem:[%s1804_s11 + $0x20] sm:$0xf] %v212_v8  ;;  %v216_v10 = vld [vmem:[%s1799_s10 + $0x168] sm:$0xf]  ;;  %v218_v11 = vld [vmem:[%s1799_s10 + $0x18c] sm:$0xf] }
  0x1f   : > { %215 = vst [vmem:[%s1804_s11 + $0x24] sm:$0xf] %v214_v9  ;;  %217 = vst [vmem:[%s1804_s11 + $0x28] sm:$0xf] %v216_v10  ;;  %v220_v12 = vld [vmem:[%s1799_s10 + $0x1b0] sm:$0xf] }
  0x20   : > { %219 = vst [vmem:[%s1804_s11 + $0x2c] sm:$0xf] %v218_v11  ;;  %v222_v13 = vld [vmem:[%s1799_s10 + $0x1d4] sm:$0xf]  ;;  %v224_v14 = vld [vmem:[%s1799_s10 + $0x1f8] sm:$0xf] }
  0x21   : > { %221 = vst [vmem:[%s1804_s11 + $0x30] sm:$0xf] %v220_v12  ;;  %223 = vst [vmem:[%s1804_s11 + $0x34] sm:$0xf] %v222_v13  ;;  %v226_v15 = vld [vmem:[%s1799_s10 + $0x21c] sm:$0xf] }
  0x22   : > { %225 = vst [vmem:[%s1804_s11 + $0x38] sm:$0xf] %v224_v14  ;;  %v228_v16 = vld [vmem:[%s1799_s10 + $0x240] sm:$0xf]  ;;  %v230_v17 = vld [vmem:[%s1799_s10 + $0x264] sm:$0xf] }
  0x23   : > { %227 = vst [vmem:[%s1804_s11 + $0x3c] sm:$0xf] %v226_v15  ;;  %229 = vst [vmem:[%s1804_s11 + $0x40] sm:$0xf] %v228_v16  ;;  %v232_v18 = vld [vmem:[%s1799_s10 + $0x288] sm:$0xf] }
  0x24   : > { %231 = vst [vmem:[%s1804_s11 + $0x44] sm:$0xf] %v230_v17  ;;  %v234_v19 = vld [vmem:[%s1799_s10 + $0x2ac] sm:$0xf]  ;;  %v236_v20 = vld [vmem:[%s1799_s10 + $0x2d0] sm:$0xf] }
  0x25   : > { %233 = vst [vmem:[%s1804_s11 + $0x48] sm:$0xf] %v232_v18  ;;  %235 = vst [vmem:[%s1804_s11 + $0x4c] sm:$0xf] %v234_v19  ;;  %v238_v21 = vld [vmem:[%s1799_s10 + $0x2f4] sm:$0xf] }
  0x26   : > { %237 = vst [vmem:[%s1804_s11 + $0x50] sm:$0xf] %v236_v20  ;;  %v240_v22 = vld [vmem:[%s1799_s10 + $0x318] sm:$0xf]  ;;  %v242_v23 = vld [vmem:[%s1799_s10 + $0x33c] sm:$0xf] }
  0x27   : > { %239 = vst [vmem:[%s1804_s11 + $0x54] sm:$0xf] %v238_v21  ;;  %241 = vst [vmem:[%s1804_s11 + $0x58] sm:$0xf] %v240_v22  ;;  %v244_v24 = vld [vmem:[%s1799_s10 + $0x360] sm:$0xf] }
  0x28   : > { %243 = vst [vmem:[%s1804_s11 + $0x5c] sm:$0xf] %v242_v23  ;;  %v246_v25 = vld [vmem:[%s1799_s10 + $0x384] sm:$0xf]  ;;  %v248_v26 = vld [vmem:[%s1799_s10 + $0x3a8] sm:$0xf] }
  0x29   : > { %245 = vst [vmem:[%s1804_s11 + $0x60] sm:$0xf] %v244_v24  ;;  %247 = vst [vmem:[%s1804_s11 + $0x64] sm:$0xf] %v246_v25  ;;  %v250_v27 = vld [vmem:[%s1799_s10 + $0x3cc] sm:$0xf] }
  0x2a   : > { %249 = vst [vmem:[%s1804_s11 + $0x68] sm:$0xf] %v248_v26  ;;  %v252_v28 = vld [vmem:[%s1799_s10 + $0x3f0] sm:$0xf]  ;;  %v254_v29 = vld [vmem:[%s1799_s10 + $0x414] sm:$0xf] }
  0x2b   : > { %251 = vst [vmem:[%s1804_s11 + $0x6c] sm:$0xf] %v250_v27  ;;  %253 = vst [vmem:[%s1804_s11 + $0x70] sm:$0xf] %v252_v28  ;;  %v256_v30 = vld [vmem:[%s1799_s10 + $0x438] sm:$0xf] }
  0x2c   : > { %255 = vst [vmem:[%s1804_s11 + $0x74] sm:$0xf] %v254_v29  ;;  %v258_v31 = vld [vmem:[%s1799_s10 + $0x45c] sm:$0xf]  ;;  %257 = vst [vmem:[%s1804_s11 + $0x78] sm:$0xf] %v256_v30 }
  0x2d   : > { %259 = vst [vmem:[%s1804_s11 + $0x7c] sm:$0xf] %v258_v31 }
  0x2e PF: > { %p1292_p7 = scmp.ge.s32.totalorder %s1711_s21, 1  ;;  %p354_p8 = scmp.lt.s32.totalorder %s1711_s21, 19 }
  0x30   : > { %p355_p9 = pnand %p1292_p7, %p354_p8 }
  0x31   : > { %s361_s12 = sand.u32 (!%p355_p9), 1, %s1687_s15   ;;  %s1294_s13 = sshll.u32 (!%p355_p9), %s1695_s17, 4 }
  0x32   : > { %358 = sbr.rel (%p355_p9) target bundleno = 375 (0x177), region = 73  ;;  %s1293_s14 = sshll.u32 (!%p355_p9), %s361_s12, 7 }
  0x33   : > { %p393_p10 = scmp.lt.s32.totalorder (!%p355_p9), %s1294_s13, 143  ;;  %s1296_s24 = sshll.u32 (!%p355_p9), %s1699_s18, 5 }
  0x34   : > { %p399_p11 = scmp.lt.s32.totalorder (!%p355_p9), %s1296_s24, 63  ;;  %s1882_s15 = scalar_lea.vmem (!%p355_p9), [#allocation3], %s1293_s14 }
  0x35   : > { %p1298_p12 = scmp.ne.s32.totalorder (!%p355_p9), %s1695_s17, 0 }
  0x39   : > { %s2039_s13 = smov (!%p393_p10, %s1294_s13), 143  ;;  %s2041_s24 = smov (!%p399_p11, %s1296_s24), 63 }
  0x3a   : > { %s1295_s25 = sshll.u32 %s2039_s13, 2  ;;  %s1297_s30 = sshll.u32 %s2041_s24, 2  ;;  %v1713_v32 = vmov (!%p1298_p12), 0.0  }
  0x3b   : > { %s1875_s29 = scalar_lea.vmem %s2022_s1, %s1295_s25  ;;  %s1880_s7 = scalar_lea.vmem %s2025_s4, %s1297_s30  ;;  %409 = vst [vmem:[#allocation2] sm:$0xff] (!%p1298_p12), %v1713_v32  ;;  %410 = vst [vmem:[#allocation2 + $0x8] sm:$0xff] (!%p1298_p12), %v1713_v32 }
  0x3c   : > { %408 = sbr.rel (%p1298_p12) target bundleno = 75 (0x4b), region = 81  ;;  %411 = vst [vmem:[#allocation2 + $0x10] sm:$0xff] (!%p1298_p12), %v1713_v32  ;;  %412 = vst [vmem:[#allocation2 + $0x18] sm:$0xff] (!%p1298_p12), %v1713_v32 }
  0x3d   : > { %413 = vst [vmem:[#allocation2 + $0x20] sm:$0xff] (!%p1298_p12), %v1713_v32  ;;  %414 = vst [vmem:[#allocation2 + $0x28] sm:$0xff] (!%p1298_p12), %v1713_v32 }
  0x3e   : > { %415 = vst [vmem:[#allocation2 + $0x30] sm:$0xff] (!%p1298_p12), %v1713_v32  ;;  %416 = vst [vmem:[#allocation2 + $0x38] sm:$0xff] (!%p1298_p12), %v1713_v32 }
  0x3f   : > { %417 = vst [vmem:[#allocation2 + $0x40] sm:$0xff] (!%p1298_p12), %v1713_v32  ;;  %418 = vst [vmem:[#allocation2 + $0x48] sm:$0xff] (!%p1298_p12), %v1713_v32 }
  0x40   : > { %419 = vst [vmem:[#allocation2 + $0x50] sm:$0xff] (!%p1298_p12), %v1713_v32  ;;  %420 = vst [vmem:[#allocation2 + $0x58] sm:$0xff] (!%p1298_p12), %v1713_v32 }
  0x41   : > { %421 = vst [vmem:[#allocation2 + $0x60] sm:$0xff] (!%p1298_p12), %v1713_v32  ;;  %422 = vst [vmem:[#allocation2 + $0x68] sm:$0xff] (!%p1298_p12), %v1713_v32 }
  0x42   : > { %423 = vst [vmem:[#allocation2 + $0x70] sm:$0xff] (!%p1298_p12), %v1713_v32  ;;  %424 = vst [vmem:[#allocation2 + $0x78] sm:$0xff] (!%p1298_p12), %v1713_v32 }
  0x43   : > { %425 = vst [vmem:[#allocation2 + $0x80] sm:$0xff] %v1713_v32  ;;  %426 = vst [vmem:[#allocation2 + $0x88] sm:$0xff] %v1713_v32 }
  0x44   : > { %427 = vst [vmem:[#allocation2 + $0x90] sm:$0xff] %v1713_v32  ;;  %428 = vst [vmem:[#allocation2 + $0x98] sm:$0xff] %v1713_v32 }
  0x45   : > { %429 = vst [vmem:[#allocation2 + $0xa0] sm:$0xff] %v1713_v32  ;;  %430 = vst [vmem:[#allocation2 + $0xa8] sm:$0xff] %v1713_v32 }
  0x46   : > { %431 = vst [vmem:[#allocation2 + $0xb0] sm:$0xff] %v1713_v32  ;;  %432 = vst [vmem:[#allocation2 + $0xb8] sm:$0xff] %v1713_v32 }
  0x47   : > { %433 = vst [vmem:[#allocation2 + $0xc0] sm:$0xff] %v1713_v32  ;;  %434 = vst [vmem:[#allocation2 + $0xc8] sm:$0xff] %v1713_v32 }
  0x48   : > { %435 = vst [vmem:[#allocation2 + $0xd0] sm:$0xff] %v1713_v32  ;;  %436 = vst [vmem:[#allocation2 + $0xd8] sm:$0xff] %v1713_v32 }
  0x49   : > { %437 = vst [vmem:[#allocation2 + $0xe0] sm:$0xff] %v1713_v32  ;;  %438 = vst [vmem:[#allocation2 + $0xe8] sm:$0xff] %v1713_v32 }
  0x4a   : > { %439 = vst [vmem:[#allocation2 + $0xf0] sm:$0xff] %v1713_v32  ;;  %440 = vst [vmem:[#allocation2 + $0xf8] sm:$0xff] %v1713_v32 }
  0x4b PF: > { %v1633_v33 = vld [vmem:[%s1875_s29] sm:$0xff]   ;;  %v1634_v34 = vld [vmem:[%s1875_s29 + $0x8] sm:$0xff]   ;;  %v1635_v35 = vld [vmem:[%s1875_s29 + $0x10] sm:$0xff]   ;;  %p1323_p13 = scmp.ne.s32.totalorder %s1695_s17, 8 }
  0x4c   : > { %1511 = vmatprep.subr.bf16.mxu0 %v1633_v33  ;;  %1559 = vmatprep.subr.bf16.mxu1 %v1633_v33  ;;  %v1636_v36 = vld [vmem:[%s1875_s29 + $0x18] sm:$0xff]   ;;  %v1641_v37 = vld [vmem:[%s1882_s15] sm:$0xff]   ;;  %v1638_v40 = vld [vmem:[%s1875_s29 + $0x28] sm:$0xff]  }
  0x4d   : > { %1512 = vmatpush3.bf16.msra.mxu0 %v1633_v33  ;;  %1567 = vmatpush3.bf16.msra.mxu1 %v1633_v33  ;;  %v1642_v38 = vld [vmem:[%s1882_s15 + $0x40] sm:$0xff]   ;;  %v1639_v41 = vld [vmem:[%s1875_s29 + $0x30] sm:$0xff]   ;;  %v1640_v42 = vld [vmem:[%s1875_s29 + $0x38] sm:$0xff]  }
  0x4e   : > { %1513 = vmatprep.subr.bf16.mxu0 %v1634_v34  ;;  %1560 = vmatprep.subr.bf16.mxu1 %v1634_v34  ;;  %v1637_v39 = vld [vmem:[%s1875_s29 + $0x20] sm:$0xff]   ;;  %v1643_v43 = vld [vmem:[%s1882_s15 + $0x8] sm:$0xff]   ;;  %v1645_v45 = vld [vmem:[%s1882_s15 + $0x10] sm:$0xff]  }
  0x4f   : > { %1527 = vmatprep.mubr.bf16.mxu0 %v1641_v37  ;;  %1543 = vmatprep.mubr.bf16.mxu1 %v1642_v38  ;;  %v1644_v44 = vld [vmem:[%s1882_s15 + $0x48] sm:$0xff]   ;;  %v1646_v46 = vld [vmem:[%s1882_s15 + $0x50] sm:$0xff]   ;;  %v1647_v47 = vld [vmem:[%s1882_s15 + $0x18] sm:$0xff]  }
  0x50   : > { %v1648_v48 = vld [vmem:[%s1882_s15 + $0x58] sm:$0xff]   ;;  %v1649_v49 = vld [vmem:[%s1882_s15 + $0x20] sm:$0xff]   ;;  %v1651_v51 = vld [vmem:[%s1882_s15 + $0x28] sm:$0xff]  }
  0x51   : > { %1514 = vmatpush3.bf16.msra.mxu0 %v1634_v34  ;;  %1568 = vmatpush3.bf16.msra.mxu1 %v1634_v34  ;;  %v1650_v50 = vld [vmem:[%s1882_s15 + $0x60] sm:$0xff]   ;;  %v1652_v52 = vld [vmem:[%s1882_s15 + $0x68] sm:$0xff]   ;;  %v1653_v53 = vld [vmem:[%s1882_s15 + $0x30] sm:$0xff]  }
  0x52   : > { %1515 = vmatprep.subr.bf16.mxu0 %v1635_v35  ;;  %1561 = vmatprep.subr.bf16.mxu1 %v1635_v35  ;;  %v1654_v54 = vld [vmem:[%s1882_s15 + $0x70] sm:$0xff]   ;;  %v1655_v55 = vld [vmem:[%s1882_s15 + $0x38] sm:$0xff]   ;;  %v441_v59 = vld [vmem:[#allocation2] sm:$0xff] }
  0x53   : > { %v1656_v56 = vld [vmem:[%s1882_s15 + $0x78] sm:$0xff]   ;;  %v443_v57 = vld [vmem:[#allocation2 + $0x10] sm:$0xff]  ;;  %v457_v60 = vld [vmem:[#allocation2 + $0x80] sm:$0xff] }
  0x54   : > { %v459_v58 = vld [vmem:[#allocation2 + $0x90] sm:$0xff]  ;;  %v444_v63 = vld [vmem:[#allocation2 + $0x18] sm:$0xff]  ;;  %v442_v5 = vld [vmem:[#allocation2 + $0x8] sm:$0xff] }
  0x55   : > { %1516 = vmatpush3.bf16.msra.mxu0 %v1635_v35  ;;  %1569 = vmatpush3.bf16.msra.mxu1 %v1635_v35  ;;  %v460_v0 = vld [vmem:[#allocation2 + $0x98] sm:$0xff]  ;;  %v458_v6 = vld [vmem:[#allocation2 + $0x88] sm:$0xff]  ;;  %v447_v17 = vld [vmem:[#allocation2 + $0x30] sm:$0xff] }
  0x56   : > { %1517 = vmatprep.subr.bf16.mxu0 %v1636_v36  ;;  %1562 = vmatprep.subr.bf16.mxu1 %v1636_v36  ;;  %v463_v18 = vld [vmem:[#allocation2 + $0xb0] sm:$0xff]  ;;  %v445_v19 = vld [vmem:[#allocation2 + $0x20] sm:$0xff]  ;;  %v448_v23 = vld [vmem:[#allocation2 + $0x38] sm:$0xff] }
  0x57   : > { %v461_v20 = vld [vmem:[#allocation2 + $0xa0] sm:$0xff]  ;;  %v464_v24 = vld [vmem:[#allocation2 + $0xb8] sm:$0xff]  ;;  %v446_v29 = vld [vmem:[#allocation2 + $0x28] sm:$0xff] }
  0x58   : > { %v462_v30 = vld [vmem:[#allocation2 + $0xa8] sm:$0xff] }
  0x59   : > { %1518 = vmatpush3.bf16.msra.mxu0 %v1636_v36  ;;  %1570 = vmatpush3.bf16.msra.mxu1 %v1636_v36 }
  0x5a   : > { %1519 = vmatprep.subr.bf16.mxu0 %v1637_v39  ;;  %1563 = vmatprep.subr.bf16.mxu1 %v1637_v39 }
  0x5d   : > { %1520 = vmatpush3.bf16.msra.mxu0 %v1637_v39  ;;  %1571 = vmatpush3.bf16.msra.mxu1 %v1637_v39 }
  0x5e   : > { %1521 = vmatprep.subr.bf16.mxu0 %v1638_v40  ;;  %1564 = vmatprep.subr.bf16.mxu1 %v1638_v40 }
  0x61   : > { %1522 = vmatpush3.bf16.msra.mxu0 %v1638_v40  ;;  %1572 = vmatpush3.bf16.msra.mxu1 %v1638_v40 }
  0x62   : > { %1523 = vmatprep.subr.bf16.mxu0 %v1639_v41  ;;  %1565 = vmatprep.subr.bf16.mxu1 %v1639_v41 }
  0x65   : > { %1524 = vmatpush3.bf16.msra.mxu0 %v1639_v41  ;;  %1573 = vmatpush3.bf16.msra.mxu1 %v1639_v41  ;;  %v451_v41 = vld [vmem:[#allocation2 + $0x50] sm:$0xff] }
  0x66   : > { %1525 = vmatprep.subr.bf16.mxu0 %v1640_v42  ;;  %1566 = vmatprep.subr.bf16.mxu1 %v1640_v42 }
  0x69   : > { %1526 = vmatpush3.bf16.msra.mxu0 %v1640_v42  ;;  %1574 = vmatpush3.bf16.msra.mxu1 %v1640_v42  ;;  %v467_v42 = vld [vmem:[#allocation2 + $0xd0] sm:$0xff] }
  0x6c   : > { %1528 = vmatmul.mubr.bf16.vlgmr.msra.gmra.mrb[0].mxu0 %v1643_v43  ;;  %1544 = vmatmul.mubr.bf16.vlgmr.msra.gmra.mrb[0].mxu1 %v1644_v44  ;;  %v449_v43 = vld [vmem:[#allocation2 + $0x40] sm:$0xff] }
  0x6d   : > { %1531 = vmatprep.mubr.bf16.mxu0 %v1645_v45  ;;  %1547 = vmatprep.mubr.bf16.mxu1 %v1646_v46  ;;  %v465_v44 = vld [vmem:[#allocation2 + $0xc0] sm:$0xff] }
  0x74   : > { %1532 = vmatmul.mubr.bf16.gmra.mrb[4].mxu0 %v1647_v47  ;;  %1548 = vmatmul.mubr.bf16.gmra.mrb[4].mxu1 %v1648_v48  ;;  %v452_v47 = vld [vmem:[#allocation2 + $0x58] sm:$0xff] }
  0x75   : > { %1535 = vmatprep.mubr.bf16.mxu0 %v1649_v49  ;;  %1551 = vmatprep.mubr.bf16.mxu1 %v1650_v50  ;;  %v468_v48 = vld [vmem:[#allocation2 + $0xd8] sm:$0xff] }
  0x7c   : > { %1536 = vmatmul.mubr.bf16.gmra.mrb[8].mxu0 %v1651_v51  ;;  %1552 = vmatmul.mubr.bf16.gmra.mrb[8].mxu1 %v1652_v52 }
  0x7d   : > { %1539 = vmatprep.mubr.bf16.mxu0 %v1653_v53  ;;  %1555 = vmatprep.mubr.bf16.mxu1 %v1654_v54  ;;  %v450_v53 = vld [vmem:[#allocation2 + $0x48] sm:$0xff] }
  0x7e   : > { %v466_v54 = vld [vmem:[#allocation2 + $0xc8] sm:$0xff] }
  0x84   : > { %1540 = vmatmul.mubr.bf16.gmra.mrb[12].mxu0 %v1655_v55  ;;  %1556 = vmatmul.mubr.bf16.gmra.mrb[12].mxu1 %v1656_v56 }
 0x13f   : > { %v1529_v61 = vpop.f32.mrb[0].mxu0  ;;  %v1545_v62 = vpop.f32.mrb[0].mxu1 }
 0x140   : > { %v828_v1 = vadd.f32 %v1529_v61, %v443_v57  ;;  %v844_v2 = vadd.f32 %v1545_v62, %v459_v58  ;;  %v699_v3 = vpop.f32.mrb[1].mxu0  ;;  %v763_v4 = vpop.f32.mrb[1].mxu1 }
 0x141   : > { %v826_v7 = vadd.f32 %v699_v3, %v441_v59  ;;  %v842_v8 = vadd.f32 %v763_v4, %v457_v60  ;;  %v1530_v9 = vpop.f32.mrb[2].mxu0  ;;  %v1546_v10 = vpop.f32.mrb[2].mxu1  ;;  %v453_v3 = vld [vmem:[#allocation2 + $0x60] sm:$0xff] }
 0x142   : > { %860 = vst [vmem:[#allocation2 + $0x10] sm:$0xff] %v828_v1  ;;  %876 = vst [vmem:[#allocation2 + $0x90] sm:$0xff] %v844_v2  ;;  %v829_v11 = vadd.f32 %v1530_v9, %v444_v63  ;;  %v845_v12 = vadd.f32 %v1546_v10, %v460_v0  ;;  %v702_v13 = vpop.f32.mrb[3].mxu0  ;;  %v766_v14 = vpop.f32.mrb[3].mxu1  ;;  %v455_v1 = vld [vmem:[#allocation2 + $0x70] sm:$0xff]  ;;  %v469_v4 = vld [vmem:[#allocation2 + $0xe0] sm:$0xff] }
 0x143   : > { %858 = vst [vmem:[#allocation2] sm:$0xff] %v826_v7  ;;  %874 = vst [vmem:[#allocation2 + $0x80] sm:$0xff] %v842_v8  ;;  %v827_v15 = vadd.f32 %v702_v13, %v442_v5  ;;  %v843_v16 = vadd.f32 %v766_v14, %v458_v6  ;;  %v471_v2 = vld [vmem:[#allocation2 + $0xf0] sm:$0xff]  ;;  %v456_v7 = vld [vmem:[#allocation2 + $0x78] sm:$0xff] }
 0x144   : > { %861 = vst [vmem:[#allocation2 + $0x18] sm:$0xff] %v829_v11  ;;  %877 = vst [vmem:[#allocation2 + $0x98] sm:$0xff] %v845_v12  ;;  %v472_v8 = vld [vmem:[#allocation2 + $0xf8] sm:$0xff]  ;;  %v454_v13 = vld [vmem:[#allocation2 + $0x68] sm:$0xff] }
 0x145   : > { %859 = vst [vmem:[#allocation2 + $0x8] sm:$0xff] %v827_v15  ;;  %875 = vst [vmem:[#allocation2 + $0x88] sm:$0xff] %v843_v16  ;;  %v470_v14 = vld [vmem:[#allocation2 + $0xe8] sm:$0xff] }
 0x147   : > { %v1533_v21 = vpop.f32.mrb[4].mxu0  ;;  %v1549_v22 = vpop.f32.mrb[4].mxu1 }
 0x148   : > { %v832_v25 = vadd.f32 %v1533_v21, %v447_v17  ;;  %v848_v26 = vadd.f32 %v1549_v22, %v463_v18  ;;  %v715_v27 = vpop.f32.mrb[5].mxu0  ;;  %v779_v28 = vpop.f32.mrb[5].mxu1 }
 0x149   : > { %v830_v31 = vadd.f32 %v715_v27, %v445_v19  ;;  %v846_v32 = vadd.f32 %v779_v28, %v461_v20  ;;  %v1534_v33 = vpop.f32.mrb[6].mxu0  ;;  %v1550_v34 = vpop.f32.mrb[6].mxu1  ;;  %v1913_v27 = vld [vmem:[%s2023_s2] ss:$0 sm:$0xff] (!%p1323_p13) }
 0x14a   : > { %864 = vst [vmem:[#allocation2 + $0x30] sm:$0xff] %v832_v25  ;;  %880 = vst [vmem:[#allocation2 + $0xb0] sm:$0xff] %v848_v26  ;;  %v833_v35 = vadd.f32 %v1534_v33, %v448_v23  ;;  %v849_v36 = vadd.f32 %v1550_v34, %v464_v24  ;;  %v718_v37 = vpop.f32.mrb[7].mxu0  ;;  %v782_v38 = vpop.f32.mrb[7].mxu1  ;;  %v894_v25 = vld [vmem:[#allocation2] sm:$0xff] (!%p1323_p13) }
 0x14b   : > { %862 = vst [vmem:[#allocation2 + $0x20] sm:$0xff] %v830_v31  ;;  %878 = vst [vmem:[#allocation2 + $0xa0] sm:$0xff] %v846_v32  ;;  %v831_v39 = vadd.f32 %v718_v37, %v446_v29  ;;  %v847_v40 = vadd.f32 %v782_v38, %v462_v30  ;;  %v933_v28 = vmul.f32 (!%p1323_p13), %v1913_v27, %v894_v25  ;;  %v1920_v30 = vld [vmem:[%s2024_s3] ss:$0 sm:$0xff] (!%p1323_p13)  ;;  %v896_v31 = vld [vmem:[#allocation2 + $0x10] sm:$0xff] (!%p1323_p13) }
 0x14c   : > { %865 = vst [vmem:[#allocation2 + $0x38] sm:$0xff] %v833_v35  ;;  %881 = vst [vmem:[#allocation2 + $0xb8] sm:$0xff] %v849_v36  ;;  %v895_v26 = vld [vmem:[#allocation2 + $0x8] sm:$0xff] (!%p1323_p13)  ;;  %v897_v32 = vld [vmem:[#allocation2 + $0x18] sm:$0xff] (!%p1323_p13)  ;;  %v935_v33 = vmul.f32 (!%p1323_p13), %v1913_v27, %v896_v31 }
 0x14d   : > { %863 = vst [vmem:[#allocation2 + $0x28] sm:$0xff] %v831_v39  ;;  %879 = vst [vmem:[#allocation2 + $0xa8] sm:$0xff] %v847_v40  ;;  %v934_v29 = vmul.f32 (!%p1323_p13), %v1913_v27, %v895_v26  ;;  %v936_v34 = vmul.f32 (!%p1323_p13), %v1913_v27, %v897_v32  ;;  %v972_v38 = vadd.f32 (!%p1323_p13), %v1920_v30, %v933_v28  ;;  %v912_v31 = vld [vmem:[#allocation2 + $0x90] sm:$0xff] (!%p1323_p13)  ;;  %v913_v32 = vld [vmem:[#allocation2 + $0x98] sm:$0xff] (!%p1323_p13) }
 0x14f   : > { %v1537_v45 = vpop.f32.mrb[8].mxu0  ;;  %v1553_v46 = vpop.f32.mrb[8].mxu1  ;;  %v973_v39 = vadd.f32 (!%p1323_p13), %v1920_v30, %v934_v29 }
 0x150   : > { %v836_v49 = vadd.f32 %v1537_v45, %v451_v41  ;;  %v852_v50 = vadd.f32 %v1553_v46, %v467_v42  ;;  %v731_v51 = vpop.f32.mrb[9].mxu0  ;;  %v795_v52 = vpop.f32.mrb[9].mxu1 }
 0x151   : > { %v834_v55 = vadd.f32 %v731_v51, %v449_v43  ;;  %v850_v56 = vadd.f32 %v795_v52, %v465_v44  ;;  %v1538_v57 = vpop.f32.mrb[10].mxu0  ;;  %v1554_v58 = vpop.f32.mrb[10].mxu1  ;;  %v900_v37 = vld [vmem:[#allocation2 + $0x30] sm:$0xff] (!%p1323_p13)  ;;  %v974_v43 = vadd.f32 (!%p1323_p13), %v1920_v30, %v935_v33  ;;  %v975_v44 = vadd.f32 (!%p1323_p13), %v1920_v30, %v936_v34 }
 0x152   : > { %868 = vst [vmem:[#allocation2 + $0x50] sm:$0xff] %v836_v49  ;;  %884 = vst [vmem:[#allocation2 + $0xd0] sm:$0xff] %v852_v50  ;;  %v837_v59 = vadd.f32 %v1538_v57, %v452_v47  ;;  %v853_v60 = vadd.f32 %v1554_v58, %v468_v48  ;;  %v734_v61 = vpop.f32.mrb[11].mxu0  ;;  %v798_v62 = vpop.f32.mrb[11].mxu1  ;;  %v898_v35 = vld [vmem:[#allocation2 + $0x20] sm:$0xff] (!%p1323_p13)  ;;  %v939_v45 = vmul.f32 (!%p1323_p13), %v1913_v27, %v900_v37  ;;  %v1004_v48 = vmax.f32 (!%p1323_p13), %v972_v38, 0.0 }
 0x153   : > { %866 = vst [vmem:[#allocation2 + $0x40] sm:$0xff] %v834_v55  ;;  %882 = vst [vmem:[#allocation2 + $0xc0] sm:$0xff] %v850_v56  ;;  %v835_v63 = vadd.f32 %v734_v61, %v450_v53  ;;  %v851_v0 = vadd.f32 %v798_v62, %v466_v54  ;;  %v937_v40 = vmul.f32 (!%p1323_p13), %v1913_v27, %v898_v35  ;;  %v901_v42 = vld [vmem:[#allocation2 + $0x38] sm:$0xff] (!%p1323_p13)  ;;  %v1005_v49 = vmax.f32 (!%p1323_p13), %v973_v39, 0.0  ;;  %v914_v37 = vld [vmem:[#allocation2 + $0xa0] sm:$0xff] (!%p1323_p13) }
 0x154   : > { %869 = vst [vmem:[#allocation2 + $0x58] sm:$0xff] %v837_v59  ;;  %885 = vst [vmem:[#allocation2 + $0xd8] sm:$0xff] %v853_v60  ;;  %v899_v36 = vld [vmem:[#allocation2 + $0x28] sm:$0xff] (!%p1323_p13)  ;;  %v940_v46 = vmul.f32 (!%p1323_p13), %v1913_v27, %v901_v42  ;;  %v1006_v53 = vmax.f32 (!%p1323_p13), %v974_v43, 0.0  ;;  %v1007_v54 = vmax.f32 (!%p1323_p13), %v975_v44, 0.0  ;;  %v978_v55 = vadd.f32 (!%p1323_p13), %v1920_v30, %v939_v45  ;;  %v916_v43 = vld [vmem:[#allocation2 + $0xb0] sm:$0xff] (!%p1323_p13) }
 0x155   : > { %867 = vst [vmem:[#allocation2 + $0x48] sm:$0xff] %v835_v63  ;;  %883 = vst [vmem:[#allocation2 + $0xc8] sm:$0xff] %v851_v0  ;;  %v938_v41 = vmul.f32 (!%p1323_p13), %v1913_v27, %v899_v36  ;;  %v976_v50 = vadd.f32 (!%p1323_p13), %v1920_v30, %v937_v40  ;;  %v1395_v59 = vpack.c.bf16 (!%p1323_p13), %v1005_v49, %v1004_v48  ;;  %v915_v38 = vld [vmem:[#allocation2 + $0xa8] sm:$0xff] (!%p1323_p13)  ;;  %v917_v48 = vld [vmem:[#allocation2 + $0xb8] sm:$0xff] (!%p1323_p13) }
 0x156   : > { %v979_v56 = vadd.f32 (!%p1323_p13), %v1920_v30, %v940_v46  ;;  %v951_v46 = vmul.f32 (!%p1323_p13), %v1913_v27, %v912_v31 }
 0x157   : > { %v1541_v5 = vpop.f32.mrb[12].mxu0  ;;  %v1557_v6 = vpop.f32.mrb[12].mxu1  ;;  %893 = sbr.rel (%p1323_p13) target bundleno = 375 (0x177), region = 85  ;;  %v977_v51 = vadd.f32 (!%p1323_p13), %v1920_v30, %v938_v41  ;;  %v1008_v60 = vmax.f32 (!%p1323_p13), %v976_v50, 0.0  ;;  %1396 = vst [vmem:[%s1880_s7] sm:$0xff] (!%p1323_p13), %v1395_v59  }
 0x158   : > { %v840_v9 = vadd.f32 %v1541_v5, %v455_v1  ;;  %v856_v10 = vadd.f32 %v1557_v6, %v471_v2  ;;  %v747_v11 = vpop.f32.mrb[13].mxu0  ;;  %v811_v12 = vpop.f32.mrb[13].mxu1  ;;  %v1400_v1 = vpack.c.bf16 (!%p1323_p13), %v1007_v54, %v1006_v53  ;;  %v1010_v2 = vmax.f32 (!%p1323_p13), %v978_v55, 0.0 }
 0x159   : > { %v838_v15 = vadd.f32 %v747_v11, %v453_v3  ;;  %v854_v16 = vadd.f32 %v811_v12, %v469_v4  ;;  %v1542_v17 = vpop.f32.mrb[14].mxu0  ;;  %v1558_v18 = vpop.f32.mrb[14].mxu1  ;;  %v904_v57 = vld [vmem:[#allocation2 + $0x50] sm:$0xff] (!%p1323_p13)  ;;  %v1009_v61 = vmax.f32 (!%p1323_p13), %v977_v51, 0.0  ;;  %v1011_v3 = vmax.f32 (!%p1323_p13), %v979_v56, 0.0 }
 0x15a   : > { %872 = vst [vmem:[#allocation2 + $0x70] sm:$0xff] %v840_v9  ;;  %888 = vst [vmem:[#allocation2 + $0xf0] sm:$0xff] %v856_v10  ;;  %v841_v19 = vadd.f32 %v1542_v17, %v456_v7  ;;  %v857_v20 = vadd.f32 %v1558_v18, %v472_v8  ;;  %v750_v21 = vpop.f32.mrb[15].mxu0  ;;  %v814_v22 = vpop.f32.mrb[15].mxu1  ;;  %v902_v47 = vld [vmem:[#allocation2 + $0x40] sm:$0xff] (!%p1323_p13)  ;;  %v943_v8 = vmul.f32 (!%p1323_p13), %v1913_v27, %v904_v57 }
 0x15b   : > { %870 = vst [vmem:[#allocation2 + $0x60] sm:$0xff] %v838_v15  ;;  %886 = vst [vmem:[#allocation2 + $0xe0] sm:$0xff] %v854_v16  ;;  %v839_v23 = vadd.f32 %v750_v21, %v454_v13  ;;  %v855_v24 = vadd.f32 %v814_v22, %v470_v14  ;;  %v905_v58 = vld [vmem:[#allocation2 + $0x58] sm:$0xff] (!%p1323_p13)  ;;  %v941_v62 = vmul.f32 (!%p1323_p13), %v1913_v27, %v902_v47  ;;  %v910_v15 = vld [vmem:[#allocation2 + $0x80] sm:$0xff] (!%p1323_p13) }
 0x15c   : > { %873 = vst [vmem:[#allocation2 + $0x78] sm:$0xff] %v841_v19  ;;  %889 = vst [vmem:[#allocation2 + $0xf8] sm:$0xff] %v857_v20  ;;  %v903_v52 = vld [vmem:[#allocation2 + $0x48] sm:$0xff] (!%p1323_p13)  ;;  %v1405_v6 = vpack.c.bf16 (!%p1323_p13), %v1009_v61, %v1008_v60  ;;  %v944_v9 = vmul.f32 (!%p1323_p13), %v1913_v27, %v905_v58  ;;  %v1410_v11 = vpack.c.bf16 (!%p1323_p13), %v1011_v3, %v1010_v2  ;;  %v918_v53 = vld [vmem:[#allocation2 + $0xc0] sm:$0xff] (!%p1323_p13) }
 0x15d   : > { %871 = vst [vmem:[#allocation2 + $0x68] sm:$0xff] %v839_v23  ;;  %887 = vst [vmem:[#allocation2 + $0xe8] sm:$0xff] %v855_v24  ;;  %v942_v4 = vmul.f32 (!%p1323_p13), %v1913_v27, %v903_v52  ;;  %v980_v7 = vadd.f32 (!%p1323_p13), %v1920_v30, %v941_v62  ;;  %v982_v17 = vadd.f32 (!%p1323_p13), %v1920_v30, %v943_v8  ;;  %v911_v24 = vld [vmem:[#allocation2 + $0x88] sm:$0xff] (!%p1323_p13)  ;;  %v920_v3 = vld [vmem:[#allocation2 + $0xd0] sm:$0xff] (!%p1323_p13) }
 0x15e   : > { %1472 = vst [vmem:[%s1880_s7 + $0x8] sm:$0xff] %v1400_v1   ;;  %1473 = vst [vmem:[%s1880_s7 + $0x10] sm:$0xff] %v1405_v6   ;;  %v983_v18 = vadd.f32 %v1920_v30, %v944_v9  ;;  %v949_v29 = vmul.f32 %v1913_v27, %v910_v15  ;;  %v950_v41 = vmul.f32 %v1913_v27, %v911_v24  ;;  %v919_v62 = vld [vmem:[#allocation2 + $0xc8] sm:$0xff] }
 0x15f   : > { %v981_v12 = vadd.f32 %v1920_v30, %v942_v4  ;;  %v1012_v16 = vmax.f32 %v980_v7, 0.0  ;;  %1474 = vst [vmem:[%s1880_s7 + $0x18] sm:$0xff] %v1410_v11   ;;  %v1014_v25 = vmax.f32 %v982_v17, 0.0  ;;  %v952_v47 = vmul.f32 %v1913_v27, %v913_v32  ;;  %v921_v4 = vld [vmem:[#allocation2 + $0xd8] sm:$0xff] }
 0x160   : > { %v1015_v26 = vmax.f32 %v983_v18, 0.0  ;;  %v988_v42 = vadd.f32 %v1920_v30, %v949_v29  ;;  %v989_v49 = vadd.f32 %v1920_v30, %v950_v41  ;;  %v953_v51 = vmul.f32 %v1913_v27, %v914_v37 }
 0x161   : > { %v908_v5 = vld [vmem:[#allocation2 + $0x70] sm:$0xff]  ;;  %v1013_v20 = vmax.f32 %v981_v12, 0.0  ;;  %v954_v52 = vmul.f32 %v1913_v27, %v915_v38  ;;  %v990_v55 = vadd.f32 %v1920_v30, %v951_v46  ;;  %v991_v56 = vadd.f32 %v1920_v30, %v952_v47 }
 0x162   : > { %v906_v63 = vld [vmem:[#allocation2 + $0x60] sm:$0xff]  ;;  %v947_v19 = vmul.f32 %v1913_v27, %v908_v5  ;;  %v1420_v39 = vpack.c.bf16 %v1015_v26, %v1014_v25  ;;  %v1020_v50 = vmax.f32 %v988_v42, 0.0  ;;  %v955_v57 = vmul.f32 %v1913_v27, %v916_v43  ;;  %v924_v15 = vld [vmem:[#allocation2 + $0xf0] sm:$0xff] }
 0x163   : > { %v909_v10 = vld [vmem:[#allocation2 + $0x78] sm:$0xff]  ;;  %v945_v13 = vmul.f32 %v1913_v27, %v906_v63  ;;  %v1415_v33 = vpack.c.bf16 %v1013_v20, %v1012_v16  ;;  %v1021_v58 = vmax.f32 %v989_v49, 0.0  ;;  %v992_v59 = vadd.f32 %v1920_v30, %v953_v51  ;;  %v922_v9 = vld [vmem:[#allocation2 + $0xe0] sm:$0xff] }
 0x164   : > { %v907_v0 = vld [vmem:[#allocation2 + $0x68] sm:$0xff]  ;;  %v948_v23 = vmul.f32 %v1913_v27, %v909_v10  ;;  %v986_v28 = vadd.f32 %v1920_v30, %v947_v19  ;;  %1476 = vst [vmem:[%s1880_s7 + $0x28] sm:$0xff] %v1420_v39   ;;  %v993_v60 = vadd.f32 %v1920_v30, %v954_v52  ;;  %v956_v61 = vmul.f32 %v1913_v27, %v917_v48  ;;  %v925_v20 = vld [vmem:[#allocation2 + $0xf8] sm:$0xff] }
 0x165   : > { %v946_v14 = vmul.f32 %v1913_v27, %v907_v0  ;;  %v984_v21 = vadd.f32 %v1920_v30, %v945_v13  ;;  %1475 = vst [vmem:[%s1880_s7 + $0x20] sm:$0xff] %v1415_v33   ;;  %v1022_v63 = vmax.f32 %v990_v55, 0.0  ;;  %v1023_v0 = vmax.f32 %v991_v56, 0.0  ;;  %v923_v10 = vld [vmem:[#allocation2 + $0xe8] sm:$0xff] }
 0x166   : > { %v987_v36 = vadd.f32 %v1920_v30, %v948_v23  ;;  %v1018_v40 = vmax.f32 %v986_v28, 0.0  ;;  %v994_v1 = vadd.f32 %v1920_v30, %v955_v57  ;;  %v957_v2 = vmul.f32 %v1913_v27, %v918_v53 }
 0x167   : > { %v985_v22 = vadd.f32 %v1920_v30, %v946_v14  ;;  %v1016_v34 = vmax.f32 %v984_v21, 0.0  ;;  %v1435_v5 = vpack.c.bf16 %v1021_v58, %v1020_v50  ;;  %v1024_v6 = vmax.f32 %v992_v59, 0.0 }
 0x168   : > { %v1019_v45 = vmax.f32 %v987_v36, 0.0  ;;  %v1025_v7 = vmax.f32 %v993_v60, 0.0  ;;  %v995_v8 = vadd.f32 %v1920_v30, %v956_v61  ;;  %v1440_v11 = vpack.c.bf16 %v1023_v0, %v1022_v63 }
 0x169   : > { %v1017_v35 = vmax.f32 %v985_v22, 0.0  ;;  %v1026_v12 = vmax.f32 %v994_v1, 0.0  ;;  %v958_v13 = vmul.f32 %v1913_v27, %v919_v62  ;;  %v996_v14 = vadd.f32 %v1920_v30, %v957_v2  ;;  %1479 = vst [vmem:[%s1880_s7 + $0x40] sm:$0xff] %v1435_v5  }
 0x16a   : > { %v1430_v54 = vpack.c.bf16 %v1019_v45, %v1018_v40  ;;  %v1445_v16 = vpack.c.bf16 %v1025_v7, %v1024_v6  ;;  %v1027_v17 = vmax.f32 %v995_v8, 0.0  ;;  %v959_v18 = vmul.f32 %v1913_v27, %v920_v3  ;;  %1480 = vst [vmem:[%s1880_s7 + $0x48] sm:$0xff] %v1440_v11  }
 0x16b   : > { %v1425_v44 = vpack.c.bf16 %v1017_v35, %v1016_v34  ;;  %v960_v19 = vmul.f32 %v1913_v27, %v921_v4  ;;  %v997_v21 = vadd.f32 %v1920_v30, %v958_v13  ;;  %v1028_v22 = vmax.f32 %v996_v14, 0.0 }
 0x16c   : > { %1478 = vst [vmem:[%s1880_s7 + $0x38] sm:$0xff] %v1430_v54   ;;  %v961_v23 = vmul.f32 %v1913_v27, %v922_v9  ;;  %v962_v24 = vmul.f32 %v1913_v27, %v923_v10  ;;  %1481 = vst [vmem:[%s1880_s7 + $0x50] sm:$0xff] %v1445_v16   ;;  %v1450_v25 = vpack.c.bf16 %v1027_v17, %v1026_v12 }
 0x16d   : > { %1477 = vst [vmem:[%s1880_s7 + $0x30] sm:$0xff] %v1425_v44   ;;  %v998_v26 = vadd.f32 %v1920_v30, %v959_v18  ;;  %v999_v28 = vadd.f32 %v1920_v30, %v960_v19  ;;  %v963_v29 = vmul.f32 %v1913_v27, %v924_v15  ;;  %v1029_v31 = vmax.f32 %v997_v21, 0.0 }
 0x16e   : > { %v1000_v32 = vadd.f32 %v1920_v30, %v961_v23  ;;  %v1001_v33 = vadd.f32 %v1920_v30, %v962_v24  ;;  %v964_v34 = vmul.f32 %v1913_v27, %v925_v20  ;;  %1482 = vst [vmem:[%s1880_s7 + $0x58] sm:$0xff] %v1450_v25  }
 0x16f   : > { %v1030_v35 = vmax.f32 %v998_v26, 0.0  ;;  %v1031_v36 = vmax.f32 %v999_v28, 0.0  ;;  %v1002_v37 = vadd.f32 %v1920_v30, %v963_v29  ;;  %v1455_v38 = vpack.c.bf16 %v1029_v31, %v1028_v22 }
 0x170   : > { %v1032_v39 = vmax.f32 %v1000_v32, 0.0  ;;  %v1033_v40 = vmax.f32 %v1001_v33, 0.0  ;;  %v1003_v41 = vadd.f32 %v1920_v30, %v964_v34 }
 0x171   : > { %v1460_v42 = vpack.c.bf16 %v1031_v36, %v1030_v35  ;;  %v1034_v43 = vmax.f32 %v1002_v37, 0.0  ;;  %1483 = vst [vmem:[%s1880_s7 + $0x60] sm:$0xff] %v1455_v38  }
 0x172   : > { %v1465_v44 = vpack.c.bf16 %v1033_v40, %v1032_v39  ;;  %v1035_v45 = vmax.f32 %v1003_v41, 0.0 }
 0x173   : > { %1484 = vst [vmem:[%s1880_s7 + $0x68] sm:$0xff] %v1460_v42  }
 0x174   : > { %1485 = vst [vmem:[%s1880_s7 + $0x70] sm:$0xff] %v1465_v44   ;;  %v1470_v46 = vpack.c.bf16 %v1035_v45, %v1034_v43 }
 0x176   : > { %1486 = vst [vmem:[%s1880_s7 + $0x78] sm:$0xff] %v1470_v46  }
 0x177 PF: > { %s14_s21 = sadd.s32 1, %s1711_s21   ;;  %s2026_s15 = smov %s1691_s16 }
 0x178   : > { %p11_p0 = scmp.ge.s32.totalorder %s14_s21, 20   ;;  %s2027_s16 = smov %s1790_s28 }
 0x179   : > { %s2028_s17 = smov %s1703_s19  ;;  %s2029_s18 = smov %s1707_s20 }
 0x17a   : > { %s2030_s19 = smov %s2033_s22  ;;  %s2031_s20 = smov %s2037_s23 }
 0x17b   :  { %13 = sbr.rel (!%p11_p0) target bundleno = 4 (0x4), region = 123 }

// kernel: _lambda_.7
= control target key start
LH: loop header
LB: loop body
LE: loop exit
PB: predicated region body
PF: predicated region fallthrough
CT: control target
= control target key end

     0   :  { %s1458_s18 = smov 0   ;;  %s1460_s19 = smov 0   ;;  %s1798_s0 = inlined_call_operand.vmem [shape: bf16[512,128], index: 0, kind: input, shape index: {}]   ;;  %s1799_s1 = inlined_call_operand.vmem [shape: bf16[128,128], index: 1, kind: input, shape index: {}]   ;;  %s1800_s2 = inlined_call_operand.vmem [shape: f32[1,128], index: 2, kind: input, shape index: {}]   ;;  %s1801_s3 = inlined_call_operand.vmem [shape: f32[1,128], index: 3, kind: input, shape index: {}]   ;;  %s1802_s4 = inlined_call_operand.vmem [shape: bf16[512,128], index: 4, kind: input, shape index: {}]   ;;  %s1803_s5 = inlined_call_operand.vmem [shape: f32[512,128], index: 5, kind: output, shape index: {}]  }
   0x1   :  { %s1462_s20 = smov 0  }
   0x2 LB: > { %s27_s21 = sadd.s32 1, %s1422_s19  ;;  %p1154_p0 = scmp.ge.s32.totalorder %s1426_s20, 1  ;;  %s1426_s20 = sphi %s1462_s20, %s15_s20   ;;  %s1422_s19 = sphi %s1460_s19, %s1808_s19   ;;  %s1418_s18 = sphi %s1458_s18, %s1807_s18  }
   0x3   : > { %p29_p1 = scmp.ge.s32.totalorder %s27_s21, 2  ;;  %p227_p2 = scmp.lt.s32.totalorder %s1426_s20, 3 }
   0x5   : > { %s1810_s21 = smov (%p29_p1, %s27_s21), 0  ;;  %p228_p3 = pnand %p1154_p0, %p227_p2 }
   0x6   : > { %v1380_v0 = vld [vmem:[%s1799_s1] sm:$0xff] (!%p228_p3)   ;;  %s1155_s24 = sshll.u32 (!%p228_p3), %s1418_s18, 5  ;;  %v1381_v1 = vld [vmem:[%s1799_s1 + $0x8] sm:$0xff] (!%p228_p3)   ;;  %v1382_v2 = vld [vmem:[%s1799_s1 + $0x10] sm:$0xff] (!%p228_p3)  }
   0x7   : > { %231 = sbr.rel (%p228_p3) target bundleno = 291 (0x123), region = 40  ;;  %p269_p4 = scmp.lt.s32.totalorder (!%p228_p3), %s1155_s24, 63  ;;  %1292 = vmatprep.subr.bf16.mxu0 (!%p228_p3), %v1380_v0  ;;  %1340 = vmatprep.subr.bf16.mxu1 (!%p228_p3), %v1380_v0  ;;  %v1383_v3 = vld [vmem:[%s1799_s1 + $0x18] sm:$0xff] (!%p228_p3)   ;;  %v1384_v6 = vld [vmem:[%s1799_s1 + $0x20] sm:$0xff] (!%p228_p3)   ;;  %v1385_v7 = vld [vmem:[%s1799_s1 + $0x28] sm:$0xff] (!%p228_p3)  }
   0x8   : > { %1293 = vmatpush3.bf16.msra.mxu0 (!%p228_p3), %v1380_v0  ;;  %1348 = vmatpush3.bf16.msra.mxu1 (!%p228_p3), %v1380_v0  ;;  %v1386_v8 = vld [vmem:[%s1799_s1 + $0x30] sm:$0xff] (!%p228_p3)   ;;  %v1387_v9 = vld [vmem:[%s1799_s1 + $0x38] sm:$0xff] (!%p228_p3)   ;;  %v1600_v56 = vld [vmem:[%s1800_s2] ss:$0 sm:$0xff] (!%p228_p3) }
   0x9   : > { %1294 = vmatprep.subr.bf16.mxu0 (!%p228_p3), %v1381_v1  ;;  %1341 = vmatprep.subr.bf16.mxu1 (!%p228_p3), %v1381_v1 }
   0xc   : > { %1295 = vmatpush3.bf16.msra.mxu0 (!%p228_p3), %v1381_v1  ;;  %1349 = vmatpush3.bf16.msra.mxu1 (!%p228_p3), %v1381_v1 }
   0xd   : > { %1296 = vmatprep.subr.bf16.mxu0 (!%p228_p3), %v1382_v2  ;;  %1342 = vmatprep.subr.bf16.mxu1 (!%p228_p3), %v1382_v2 }
   0xe   : > { %s1812_s24 = smov (!%p269_p4, %s1155_s24), 63 }
   0xf   : > { %s1156_s29 = sshll.u32 %s1812_s24, 2 }
  0x10   : > { %s1493_s7 = scalar_lea.vmem %s1798_s0, %s1156_s29  ;;  %1297 = vmatpush3.bf16.msra.mxu0 %v1382_v2  ;;  %1350 = vmatpush3.bf16.msra.mxu1 %v1382_v2  ;;  %s1531_s23 = scalar_lea.vmem %s1802_s4, %s1156_s29  ;;  %v1613_v2 = vld [vmem:[%s1801_s3] ss:$0 sm:$0xff] }
  0x11   : > { %v1388_v4 = vld [vmem:[%s1493_s7] sm:$0xff]   ;;  %1298 = vmatprep.subr.bf16.mxu0 %v1383_v3  ;;  %1343 = vmatprep.subr.bf16.mxu1 %v1383_v3  ;;  %v1390_v10 = vld [vmem:[%s1493_s7 + $0x8] sm:$0xff]   ;;  %v1392_v12 = vld [vmem:[%s1493_s7 + $0x10] sm:$0xff]   ;;  %s1160_s29 = sshll.u32 %s1812_s24, 3 }
  0x12   : > { %v1389_v5 = vld [vmem:[%s1493_s7 + $0x40] sm:$0xff]   ;;  %1308 = vmatprep.mubr.bf16.mxu0 %v1388_v4  ;;  %v1391_v11 = vld [vmem:[%s1493_s7 + $0x48] sm:$0xff]   ;;  %v1393_v13 = vld [vmem:[%s1493_s7 + $0x50] sm:$0xff]   ;;  %s1645_s6 = scalar_lea.vmem %s1803_s5, %s1160_s29 }
  0x13   : > { %1324 = vmatprep.mubr.bf16.mxu1 %v1389_v5  ;;  %v1394_v14 = vld [vmem:[%s1493_s7 + $0x18] sm:$0xff]   ;;  %v1396_v16 = vld [vmem:[%s1493_s7 + $0x20] sm:$0xff]   ;;  %v1398_v18 = vld [vmem:[%s1493_s7 + $0x28] sm:$0xff]  }
  0x14   : > { %1299 = vmatpush3.bf16.msra.mxu0 %v1383_v3  ;;  %1351 = vmatpush3.bf16.msra.mxu1 %v1383_v3  ;;  %v1395_v15 = vld [vmem:[%s1493_s7 + $0x58] sm:$0xff]   ;;  %v1397_v17 = vld [vmem:[%s1493_s7 + $0x60] sm:$0xff]   ;;  %v1399_v19 = vld [vmem:[%s1493_s7 + $0x68] sm:$0xff]  }
  0x15   : > { %1300 = vmatprep.subr.bf16.mxu0 %v1384_v6  ;;  %1344 = vmatprep.subr.bf16.mxu1 %v1384_v6  ;;  %v1400_v20 = vld [vmem:[%s1493_s7 + $0x30] sm:$0xff]   ;;  %v1402_v22 = vld [vmem:[%s1493_s7 + $0x38] sm:$0xff]   ;;  %v1534_v24 = vld [vmem:[%s1531_s23 + $0x8] sm:$0xff]  }
  0x16   : > { %v1401_v21 = vld [vmem:[%s1493_s7 + $0x70] sm:$0xff]   ;;  %v1403_v23 = vld [vmem:[%s1493_s7 + $0x78] sm:$0xff]   ;;  %v1537_v25 = vld [vmem:[%s1531_s23 + $0x48] sm:$0xff]   ;;  %v1195_v32 = vunpack.c.l.bf16 %v1534_v24  ;;  %v1196_v37 = vunpack.c.h.bf16 %v1534_v24 }
  0x17   : > { %v1540_v26 = vld [vmem:[%s1531_s23] sm:$0xff]   ;;  %v1546_v28 = vld [vmem:[%s1531_s23 + $0x18] sm:$0xff]   ;;  %v1552_v30 = vld [vmem:[%s1531_s23 + $0x10] sm:$0xff]   ;;  %v1227_v33 = vunpack.c.l.bf16 %v1537_v25  ;;  %v1228_v38 = vunpack.c.h.bf16 %v1537_v25 }
  0x18   : > { %1301 = vmatpush3.bf16.msra.mxu0 %v1384_v6  ;;  %1352 = vmatpush3.bf16.msra.mxu1 %v1384_v6  ;;  %v1543_v27 = vld [vmem:[%s1531_s23 + $0x40] sm:$0xff]   ;;  %v1549_v29 = vld [vmem:[%s1531_s23 + $0x58] sm:$0xff]   ;;  %v1555_v31 = vld [vmem:[%s1531_s23 + $0x50] sm:$0xff]   ;;  %v1191_v34 = vunpack.c.l.bf16 %v1540_v26  ;;  %v1192_v39 = vunpack.c.h.bf16 %v1540_v26  ;;  %v1203_v44 = vunpack.c.l.bf16 %v1546_v28  ;;  %v1199_v46 = vunpack.c.l.bf16 %v1552_v30 }
  0x19   : > { %1302 = vmatprep.subr.bf16.mxu0 %v1385_v7  ;;  %1345 = vmatprep.subr.bf16.mxu1 %v1385_v7  ;;  %v1223_v35 = vunpack.c.l.bf16 %v1543_v27  ;;  %v1562_v36 = vld [vmem:[%s1531_s23 + $0x28] sm:$0xff]   ;;  %v1224_v40 = vunpack.c.h.bf16 %v1543_v27  ;;  %v1572_v42 = vld [vmem:[%s1531_s23 + $0x20] sm:$0xff]   ;;  %v1235_v45 = vunpack.c.l.bf16 %v1549_v29  ;;  %v1231_v47 = vunpack.c.l.bf16 %v1555_v31  ;;  %v1582_v48 = vld [vmem:[%s1531_s23 + $0x38] sm:$0xff]  }
  0x1a   : > { %v1569_v41 = vld [vmem:[%s1531_s23 + $0x68] sm:$0xff]   ;;  %v1575_v43 = vld [vmem:[%s1531_s23 + $0x60] sm:$0xff]   ;;  %v1204_v49 = vunpack.c.h.bf16 %v1546_v28  ;;  %v1236_v50 = vunpack.c.h.bf16 %v1549_v29  ;;  %v1200_v51 = vunpack.c.h.bf16 %v1552_v30  ;;  %v1232_v52 = vunpack.c.h.bf16 %v1555_v31  ;;  %v1589_v53 = vld [vmem:[%s1531_s23 + $0x78] sm:$0xff]  }
  0x1b   : > { %v1592_v54 = vld [vmem:[%s1531_s23 + $0x30] sm:$0xff]   ;;  %v1211_v57 = vunpack.c.l.bf16 %v1562_v36  ;;  %v1243_v58 = vunpack.c.l.bf16 %v1569_v41  ;;  %v1207_v59 = vunpack.c.l.bf16 %v1572_v42  ;;  %v1239_v60 = vunpack.c.l.bf16 %v1575_v43 }
  0x1c   : > { %1303 = vmatpush3.bf16.msra.mxu0 %v1385_v7  ;;  %1353 = vmatpush3.bf16.msra.mxu1 %v1385_v7  ;;  %v1595_v55 = vld [vmem:[%s1531_s23 + $0x70] sm:$0xff]   ;;  %v1212_v61 = vunpack.c.h.bf16 %v1562_v36  ;;  %v1244_v62 = vunpack.c.h.bf16 %v1569_v41  ;;  %v1208_v63 = vunpack.c.h.bf16 %v1572_v42  ;;  %v1240_v0 = vunpack.c.h.bf16 %v1575_v43 }
  0x1d   : > { %1304 = vmatprep.subr.bf16.mxu0 %v1386_v8  ;;  %1346 = vmatprep.subr.bf16.mxu1 %v1386_v8  ;;  %v1219_v4 = vunpack.c.l.bf16 %v1582_v48  ;;  %v1251_v5 = vunpack.c.l.bf16 %v1589_v53  ;;  %v1215_v6 = vunpack.c.l.bf16 %v1592_v54  ;;  %v1247_v7 = vunpack.c.l.bf16 %v1595_v55 }
  0x20   : > { %1305 = vmatpush3.bf16.msra.mxu0 %v1386_v8  ;;  %1354 = vmatpush3.bf16.msra.mxu1 %v1386_v8 }
  0x21   : > { %1306 = vmatprep.subr.bf16.mxu0 %v1387_v9  ;;  %1347 = vmatprep.subr.bf16.mxu1 %v1387_v9 }
  0x24   : > { %1307 = vmatpush3.bf16.msra.mxu0 %v1387_v9  ;;  %1355 = vmatpush3.bf16.msra.mxu1 %v1387_v9 }
  0x27   : > { %1309 = vmatmul.mubr.bf16.vlgmr.msra.gmra.mrb[0].mxu0 %v1390_v10  ;;  %1325 = vmatmul.mubr.bf16.vlgmr.msra.gmra.mrb[0].mxu1 %v1391_v11 }
  0x28   : > { %1312 = vmatprep.mubr.bf16.mxu0 %v1392_v12  ;;  %1328 = vmatprep.mubr.bf16.mxu1 %v1393_v13  ;;  %v1220_v12 = vunpack.c.h.bf16 %v1582_v48 }
  0x2f   : > { %1313 = vmatmul.mubr.bf16.gmra.mrb[4].mxu0 %v1394_v14  ;;  %1329 = vmatmul.mubr.bf16.gmra.mrb[4].mxu1 %v1395_v15 }
  0x30   : > { %1316 = vmatprep.mubr.bf16.mxu0 %v1396_v16  ;;  %1332 = vmatprep.mubr.bf16.mxu1 %v1397_v17 }
  0x37   : > { %1317 = vmatmul.mubr.bf16.gmra.mrb[8].mxu0 %v1398_v18  ;;  %1333 = vmatmul.mubr.bf16.gmra.mrb[8].mxu1 %v1399_v19 }
  0x38   : > { %1320 = vmatprep.mubr.bf16.mxu0 %v1400_v20  ;;  %1336 = vmatprep.mubr.bf16.mxu1 %v1401_v21 }
  0x3f   : > { %1321 = vmatmul.mubr.bf16.gmra.mrb[12].mxu0 %v1402_v22  ;;  %1337 = vmatmul.mubr.bf16.gmra.mrb[12].mxu1 %v1403_v23 }
  0xfa   : > { %v1310_v1 = vpop.f32.mrb[0].mxu0  ;;  %v1326_v3 = vpop.f32.mrb[0].mxu1 }
  0xfb   : > { %v825_v8 = vmul.f32 %v1310_v1, %v1600_v56  ;;  %v841_v9 = vmul.f32 %v1326_v3, %v1600_v56  ;;  %v590_v10 = vpop.f32.mrb[1].mxu0  ;;  %v654_v11 = vpop.f32.mrb[1].mxu1 }
  0xfc   : > { %v823_v14 = vmul.f32 %v1600_v56, %v590_v10  ;;  %v839_v15 = vmul.f32 %v1600_v56, %v654_v11  ;;  %v1311_v16 = vpop.f32.mrb[2].mxu0  ;;  %v1327_v17 = vpop.f32.mrb[2].mxu1 }
  0xfd   : > { %v864_v20 = vadd.f32 %v1613_v2, %v825_v8  ;;  %v880_v21 = vadd.f32 %v1613_v2, %v841_v9  ;;  %v826_v22 = vmul.f32 %v1311_v16, %v1600_v56  ;;  %v842_v23 = vmul.f32 %v1327_v17, %v1600_v56  ;;  %v593_v1 = vpop.f32.mrb[3].mxu0  ;;  %v657_v3 = vpop.f32.mrb[3].mxu1 }
  0xfe   : > { %v862_v10 = vadd.f32 %v1613_v2, %v823_v14  ;;  %v878_v11 = vadd.f32 %v1613_v2, %v839_v15  ;;  %v824_v13 = vmul.f32 %v1600_v56, %v593_v1  ;;  %v840_v18 = vmul.f32 %v1600_v56, %v657_v3 }
  0xff   : > { %v960_v19 = vadd.f32 %v1195_v32, %v864_v20  ;;  %v976_v8 = vadd.f32 %v1227_v33, %v880_v21  ;;  %v865_v9 = vadd.f32 %v1613_v2, %v826_v22  ;;  %v881_v16 = vadd.f32 %v1613_v2, %v842_v23 }
 0x100   : > { %v958_v14 = vadd.f32 %v1191_v34, %v862_v10  ;;  %v974_v32 = vadd.f32 %v1223_v35, %v878_v11  ;;  %v863_v15 = vadd.f32 %v1613_v2, %v824_v13  ;;  %v879_v33 = vadd.f32 %v1613_v2, %v840_v18 }
 0x101   : > { %v992_v17 = vmax.f32 %v960_v19, 0.0  ;;  %v1008_v20 = vmax.f32 %v976_v8, 0.0  ;;  %v961_v21 = vadd.f32 %v1196_v37, %v865_v9  ;;  %v977_v22 = vadd.f32 %v1228_v38, %v881_v16 }
 0x102   : > { %v990_v23 = vmax.f32 %v958_v14, 0.0  ;;  %v1006_v1 = vmax.f32 %v974_v32, 0.0  ;;  %v959_v34 = vadd.f32 %v1192_v39, %v863_v15  ;;  %v975_v35 = vadd.f32 %v1224_v40, %v879_v33  ;;  %v1314_v13 = vpop.f32.mrb[4].mxu0  ;;  %v1330_v18 = vpop.f32.mrb[4].mxu1 }
 0x103   : > { %1024 = vst [vmem:[%s1645_s6 + $0x10] sm:$0xff] %v992_v17  ;;  %1040 = vst [vmem:[%s1645_s6 + $0x90] sm:$0xff] %v1008_v20  ;;  %v993_v24 = vmax.f32 %v961_v21, 0.0  ;;  %v1009_v37 = vmax.f32 %v977_v22, 0.0  ;;  %v829_v25 = vmul.f32 %v1314_v13, %v1600_v56  ;;  %v845_v38 = vmul.f32 %v1330_v18, %v1600_v56  ;;  %v606_v19 = vpop.f32.mrb[5].mxu0  ;;  %v670_v3 = vpop.f32.mrb[5].mxu1 }
 0x104   : > { %1022 = vst [vmem:[%s1645_s6] sm:$0xff] %v990_v23  ;;  %1038 = vst [vmem:[%s1645_s6 + $0x80] sm:$0xff] %v1006_v1  ;;  %v991_v26 = vmax.f32 %v959_v34, 0.0  ;;  %v1007_v27 = vmax.f32 %v975_v35, 0.0  ;;  %v827_v39 = vmul.f32 %v1600_v56, %v606_v19  ;;  %v843_v40 = vmul.f32 %v1600_v56, %v670_v3  ;;  %v1315_v10 = vpop.f32.mrb[6].mxu0  ;;  %v1331_v11 = vpop.f32.mrb[6].mxu1 }
 0x105   : > { %1025 = vst [vmem:[%s1645_s6 + $0x18] sm:$0xff] %v993_v24  ;;  %1041 = vst [vmem:[%s1645_s6 + $0x98] sm:$0xff] %v1009_v37  ;;  %v868_v8 = vadd.f32 %v1613_v2, %v829_v25  ;;  %v884_v9 = vadd.f32 %v1613_v2, %v845_v38  ;;  %v830_v16 = vmul.f32 %v1315_v10, %v1600_v56  ;;  %v609_v32 = vpop.f32.mrb[7].mxu0  ;;  %v673_v15 = vpop.f32.mrb[7].mxu1 }
 0x106   : > { %v846_v14 = vmul.f32 %v1331_v11, %v1600_v56  ;;  %1023 = vst [vmem:[%s1645_s6 + $0x8] sm:$0xff] %v991_v26  ;;  %1039 = vst [vmem:[%s1645_s6 + $0x88] sm:$0xff] %v1007_v27  ;;  %v866_v33 = vadd.f32 %v1613_v2, %v827_v39  ;;  %v882_v17 = vadd.f32 %v1613_v2, %v843_v40 }
 0x107   : > { %v828_v20 = vmul.f32 %v1600_v56, %v609_v32  ;;  %v844_v21 = vmul.f32 %v1600_v56, %v673_v15  ;;  %v964_v22 = vadd.f32 %v1203_v44, %v868_v8  ;;  %v980_v23 = vadd.f32 %v1235_v45, %v884_v9 }
 0x108   : > { %v869_v1 = vadd.f32 %v1613_v2, %v830_v16  ;;  %v885_v34 = vadd.f32 %v1613_v2, %v846_v14  ;;  %v962_v35 = vadd.f32 %v1199_v46, %v866_v33  ;;  %v978_v13 = vadd.f32 %v1231_v47, %v882_v17 }
 0x109   : > { %v867_v18 = vadd.f32 %v1613_v2, %v828_v20  ;;  %v883_v24 = vadd.f32 %v1613_v2, %v844_v21  ;;  %v996_v44 = vmax.f32 %v964_v22, 0.0  ;;  %v1012_v37 = vmax.f32 %v980_v23, 0.0 }
 0x10a   : > { %v965_v45 = vadd.f32 %v1204_v49, %v869_v1  ;;  %v981_v25 = vadd.f32 %v1236_v50, %v885_v34  ;;  %v994_v38 = vmax.f32 %v962_v35, 0.0  ;;  %v1010_v19 = vmax.f32 %v978_v13, 0.0  ;;  %v1318_v3 = vpop.f32.mrb[8].mxu0  ;;  %v1334_v26 = vpop.f32.mrb[8].mxu1 }
 0x10b   : > { %v963_v46 = vadd.f32 %v1200_v51, %v867_v18  ;;  %v979_v47 = vadd.f32 %v1232_v52, %v883_v24  ;;  %1028 = vst [vmem:[%s1645_s6 + $0x30] sm:$0xff] %v996_v44  ;;  %1044 = vst [vmem:[%s1645_s6 + $0xb0] sm:$0xff] %v1012_v37  ;;  %v833_v29 = vmul.f32 %v1318_v3, %v1600_v56  ;;  %v622_v27 = vpop.f32.mrb[9].mxu0  ;;  %v686_v39 = vpop.f32.mrb[9].mxu1 }
 0x10c   : > { %v997_v28 = vmax.f32 %v965_v45, 0.0  ;;  %v1013_v49 = vmax.f32 %v981_v25, 0.0  ;;  %v849_v50 = vmul.f32 %v1334_v26, %v1600_v56  ;;  %1026 = vst [vmem:[%s1645_s6 + $0x20] sm:$0xff] %v994_v38  ;;  %1042 = vst [vmem:[%s1645_s6 + $0xa0] sm:$0xff] %v1010_v19  ;;  %v831_v51 = vmul.f32 %v1600_v56, %v622_v27  ;;  %v1319_v40 = vpop.f32.mrb[10].mxu0  ;;  %v1335_v10 = vpop.f32.mrb[10].mxu1 }
 0x10d   : > { %v995_v30 = vmax.f32 %v963_v46, 0.0  ;;  %v1011_v31 = vmax.f32 %v979_v47, 0.0  ;;  %v847_v52 = vmul.f32 %v1600_v56, %v686_v39  ;;  %v872_v11 = vadd.f32 %v1613_v2, %v833_v29  ;;  %v625_v14 = vpop.f32.mrb[11].mxu0  ;;  %v689_v32 = vpop.f32.mrb[11].mxu1 }
 0x10e   : > { %1029 = vst [vmem:[%s1645_s6 + $0x38] sm:$0xff] %v997_v28  ;;  %1045 = vst [vmem:[%s1645_s6 + $0xb8] sm:$0xff] %v1013_v49  ;;  %v888_v8 = vadd.f32 %v1613_v2, %v849_v50  ;;  %v834_v9 = vmul.f32 %v1319_v40, %v1600_v56  ;;  %v850_v16 = vmul.f32 %v1335_v10, %v1600_v56 }
 0x10f   : > { %1027 = vst [vmem:[%s1645_s6 + $0x28] sm:$0xff] %v995_v30  ;;  %1043 = vst [vmem:[%s1645_s6 + $0xa8] sm:$0xff] %v1011_v31  ;;  %v870_v15 = vadd.f32 %v1613_v2, %v831_v51  ;;  %v886_v33 = vadd.f32 %v1613_v2, %v847_v52  ;;  %v832_v17 = vmul.f32 %v1600_v56, %v625_v14 }
 0x110   : > { %v848_v20 = vmul.f32 %v1600_v56, %v689_v32  ;;  %v968_v21 = vadd.f32 %v1211_v57, %v872_v11  ;;  %v984_v22 = vadd.f32 %v1243_v58, %v888_v8  ;;  %v873_v23 = vadd.f32 %v1613_v2, %v834_v9 }
 0x111   : > { %v889_v1 = vadd.f32 %v1613_v2, %v850_v16  ;;  %v966_v34 = vadd.f32 %v1207_v59, %v870_v15  ;;  %v982_v35 = vadd.f32 %v1239_v60, %v886_v33  ;;  %v871_v13 = vadd.f32 %v1613_v2, %v832_v17 }
 0x112   : > { %v887_v18 = vadd.f32 %v1613_v2, %v848_v20  ;;  %v1000_v57 = vmax.f32 %v968_v21, 0.0  ;;  %v1016_v24 = vmax.f32 %v984_v22, 0.0  ;;  %v969_v58 = vadd.f32 %v1212_v61, %v873_v23  ;;  %v1322_v25 = vpop.f32.mrb[12].mxu0  ;;  %v1338_v38 = vpop.f32.mrb[12].mxu1 }
 0x113   : > { %v985_v44 = vadd.f32 %v1244_v62, %v889_v1  ;;  %v998_v37 = vmax.f32 %v966_v34, 0.0  ;;  %v1014_v45 = vmax.f32 %v982_v35, 0.0  ;;  %v967_v59 = vadd.f32 %v1208_v63, %v871_v13  ;;  %v638_v19 = vpop.f32.mrb[13].mxu0  ;;  %v702_v46 = vpop.f32.mrb[13].mxu1 }
 0x114   : > { %v983_v60 = vadd.f32 %v1240_v0, %v887_v18  ;;  %1032 = vst [vmem:[%s1645_s6 + $0x50] sm:$0xff] %v1000_v57  ;;  %1048 = vst [vmem:[%s1645_s6 + $0xd0] sm:$0xff] %v1016_v24  ;;  %v1001_v36 = vmax.f32 %v969_v58, 0.0  ;;  %v837_v41 = vmul.f32 %v1322_v25, %v1600_v56  ;;  %v853_v62 = vmul.f32 %v1338_v38, %v1600_v56  ;;  %v1323_v47 = vpop.f32.mrb[14].mxu0  ;;  %v1339_v3 = vpop.f32.mrb[14].mxu1 }
 0x115   : > { %v1017_v61 = vmax.f32 %v985_v44, 0.0  ;;  %1030 = vst [vmem:[%s1645_s6 + $0x40] sm:$0xff] %v998_v37  ;;  %1046 = vst [vmem:[%s1645_s6 + $0xc0] sm:$0xff] %v1014_v45  ;;  %v999_v42 = vmax.f32 %v967_v59, 0.0  ;;  %v835_v63 = vmul.f32 %v1600_v56, %v638_v19  ;;  %v851_v0 = vmul.f32 %v1600_v56, %v702_v46  ;;  %v641_v50 = vpop.f32.mrb[15].mxu0  ;;  %v705_v27 = vpop.f32.mrb[15].mxu1 }
 0x116   : > { %v1015_v43 = vmax.f32 %v983_v60, 0.0  ;;  %1033 = vst [vmem:[%s1645_s6 + $0x58] sm:$0xff] %v1001_v36  ;;  %v876_v26 = vadd.f32 %v1613_v2, %v837_v41  ;;  %v892_v28 = vadd.f32 %v1613_v2, %v853_v62  ;;  %v838_v49 = vmul.f32 %v1323_v47, %v1600_v56 }
 0x117   : > { %1049 = vst [vmem:[%s1645_s6 + $0xd8] sm:$0xff] %v1017_v61  ;;  %v854_v29 = vmul.f32 %v1339_v3, %v1600_v56  ;;  %1031 = vst [vmem:[%s1645_s6 + $0x48] sm:$0xff] %v999_v42  ;;  %v874_v39 = vadd.f32 %v1613_v2, %v835_v63  ;;  %v890_v30 = vadd.f32 %v1613_v2, %v851_v0  ;;  %v1804_v32 = vunpack.c.h.bf16 %v1589_v53 }
 0x118   : > { %1047 = vst [vmem:[%s1645_s6 + $0xc8] sm:$0xff] %v1015_v43  ;;  %v836_v31 = vmul.f32 %v1600_v56, %v641_v50  ;;  %v852_v51 = vmul.f32 %v1600_v56, %v705_v27  ;;  %v972_v52 = vadd.f32 %v1219_v4, %v876_v26  ;;  %v988_v40 = vadd.f32 %v1251_v5, %v892_v28 }
 0x119   : > { %v877_v10 = vadd.f32 %v1613_v2, %v838_v49  ;;  %v893_v11 = vadd.f32 %v1613_v2, %v854_v29  ;;  %v970_v8 = vadd.f32 %v1215_v6, %v874_v39  ;;  %v986_v9 = vadd.f32 %v1247_v7, %v890_v30 }
 0x11a   : > { %v875_v56 = vadd.f32 %v1613_v2, %v836_v31  ;;  %v891_v4 = vadd.f32 %v1613_v2, %v852_v51  ;;  %v1004_v16 = vmax.f32 %v972_v52, 0.0  ;;  %v1020_v5 = vmax.f32 %v988_v40, 0.0 }
 0x11b   : > { %v973_v14 = vadd.f32 %v1220_v12, %v877_v10  ;;  %v989_v6 = vadd.f32 %v1804_v32, %v893_v11  ;;  %v1002_v15 = vmax.f32 %v970_v8, 0.0  ;;  %v1018_v33 = vmax.f32 %v986_v9, 0.0 }
 0x11c   : > { %v1805_v7 = vunpack.c.h.bf16 %v1592_v54  ;;  %v1806_v20 = vunpack.c.h.bf16 %v1595_v55  ;;  %1036 = vst [vmem:[%s1645_s6 + $0x70] sm:$0xff] %v1004_v16  ;;  %1052 = vst [vmem:[%s1645_s6 + $0xf0] sm:$0xff] %v1020_v5 }
 0x11d   : > { %v1005_v21 = vmax.f32 %v973_v14, 0.0  ;;  %v1021_v22 = vmax.f32 %v989_v6, 0.0  ;;  %1034 = vst [vmem:[%s1645_s6 + $0x60] sm:$0xff] %v1002_v15  ;;  %1050 = vst [vmem:[%s1645_s6 + $0xe0] sm:$0xff] %v1018_v33 }
 0x11e   : > { %v971_v17 = vadd.f32 %v1805_v7, %v875_v56  ;;  %v987_v2 = vadd.f32 %v1806_v20, %v891_v4 }
 0x11f   : > { %1037 = vst [vmem:[%s1645_s6 + $0x78] sm:$0xff] %v1005_v21  ;;  %1053 = vst [vmem:[%s1645_s6 + $0xf8] sm:$0xff] %v1021_v22 }
 0x120   : > { %v1003_v48 = vmax.f32 %v971_v17, 0.0  ;;  %v1019_v12 = vmax.f32 %v987_v2, 0.0 }
 0x122   : > { %1035 = vst [vmem:[%s1645_s6 + $0x68] sm:$0xff] %v1003_v48  ;;  %1051 = vst [vmem:[%s1645_s6 + $0xe8] sm:$0xff] %v1019_v12 }
 0x123 PF: > { %s15_s20 = sadd.s32 1, %s1426_s20   ;;  %s1807_s18 = smov %s1422_s19 }
 0x124   : > { %p12_p5 = scmp.ge.s32.totalorder %s15_s20, 4   ;;  %s1808_s19 = smov %s1810_s21 }
 0x126   :  { %14 = sbr.rel (!%p12_p5) target bundleno = 2 (0x2), region = 84 }

</bundles_post_ra>
